<compile_context>
chip_gen: v5e
topology: v5e:2x2
jax: 0.10.0
libtpu: 0.0.40
codegen_flags: <defaults>
</compile_context>

<pallas_src>
import math
import functools

import jax
import jax.numpy as jnp
from jax.experimental import pallas as pl
from jax.experimental.pallas import tpu as pltpu

_LN_EPS = 1e-5


@functools.lru_cache(maxsize=None)
def _vmem_limit_bytes():
    # ~75% of physical VMEM: 96 MiB on v5e/v6e (128 MiB phys), 48 MiB on v7x (64 MiB).
    try:
        cap = pltpu.get_tpu_info().vmem_capacity_bytes
    except Exception:
        cap = 64 * 1024 * 1024
    return int(min(cap * 3 // 4, 100 * 1024 * 1024))


def _mosaic(n_grid_axes):
    return pltpu.CompilerParams(
        dimension_semantics=("parallel",) * n_grid_axes,
        vmem_limit_bytes=_vmem_limit_bytes(),
    )


def _row_tile(m):
    # Full slab if small; otherwise 512-row tiles (multiple of 8 sublanes) so the
    # mem-bound epilogue kernels run near the HBM roofline while still pipelining.
    return m if m <= 512 else 512


def _layernorm(y, g, b):
    mu = jnp.mean(y, axis=-1, keepdims=True)
    var = jnp.mean((y - mu) ** 2, axis=-1, keepdims=True)
    return (y - mu) * jax.lax.rsqrt(var + _LN_EPS) * g + b


def _mm(a_bf16, b_bf16):
    # 2-D matmul on the MXU, bf16 operands, f32 accumulation.
    return jax.lax.dot_general(a_bf16, b_bf16, (((1,), (0,)), ((), ())),
                               preferred_element_type=jnp.float32)


# ----------------------------------------------------------------------------
# Pallas kernels
# ----------------------------------------------------------------------------

def _embed_pos_kernel(x_ref, w_ref, bpe_ref, o_ref):
    # o = x @ w + (b + pos_row)   (bias and positional row pre-folded in the wrapper)
    o_ref[...] = _mm(x_ref[...].astype(jnp.bfloat16), w_ref[...]) + bpe_ref[...]


def _attn_layer_kernel(x_ref, wqkv_ref, bqkv_ref, wo_ref, bo_ref, g_ref, b_ref, o_ref,
                       *, num_heads, head_dim, embed_dim):
    # One batch element per grid step. Fuses: QKV projection (one big lane-dense
    # MXU matmul), per-head attention (softmax in f32), output projection
    # (accumulated head-by-head straight into the lane-dense (S,E) output block),
    # residual add and LayerNorm1.
    # TODO(synk): optional src_padding_mask path (masked_fill with -inf) not wired in.
    # TODO(synk): for large S, switch to flash-style KV tiling (online softmax) and
    # grid over (B, H) / (B, q-tile) for more v7x TC parallelism.
    x = x_ref[...]                                            # (S, E) f32; also residual
    qkv = _mm(x.astype(jnp.bfloat16), wqkv_ref[...]) + bqkv_ref[...]   # (S, 3E) f32
    for h in range(num_heads):
        lo = h * head_dim
        q = qkv[:, lo:lo + head_dim].astype(jnp.bfloat16)                       # scale pre-folded
        k = qkv[:, embed_dim + lo:embed_dim + lo + head_dim].astype(jnp.bfloat16)
        v = qkv[:, 2 * embed_dim + lo:2 * embed_dim + lo + head_dim].astype(jnp.bfloat16)
        # q @ k^T (contract head_dim), softmax in f32
        s = jax.lax.dot_general(q, k, (((1,), (1,)), ((), ())),
                                preferred_element_type=jnp.float32)
        s = s - jnp.max(s, axis=-1, keepdims=True)
        p = jnp.exp(s)
        p = p * pl.reciprocal(jnp.sum(p, axis=-1, keepdims=True), approx=True)
        ctx = _mm(p.astype(jnp.bfloat16), v)                                    # (S, d) f32
        part = _mm(ctx.astype(jnp.bfloat16), wo_ref[h])                         # (S, E) f32
        if h == 0:
            o_ref[...] = part
        else:
            o_ref[...] += part
    y = o_ref[...] + bo_ref[...] + x
    o_ref[...] = _layernorm(y, g_ref[...], b_ref[...])


def _ffn_ln_kernel(*refs, final_ln):
    # o = LN2(x + relu(x @ w1 + b1) @ w2 + b2), optionally followed by the encoder's
    # final LayerNorm (fused into the last layer's call).
    # TODO(synk): for very large ff_dim on v7x (64 MiB VMEM), K-tile the F axis with an
    # f32 accumulator / single-buffered weight BlockSpecs instead of keeping both
    # bf16 weights fully resident.
    if final_ln:
        x_ref, w1_ref, b1_ref, w2_ref, b2_ref, g_ref, b_ref, gf_ref, bf_ref, o_ref = refs
    else:
        x_ref, w1_ref, b1_ref, w2_ref, b2_ref, g_ref, b_ref, o_ref = refs
    x = x_ref[...]
    h = _mm(x.astype(jnp.bfloat16), w1_ref[...]) + b1_ref[...]
    h = jnp.maximum(h, 0.0)
    ff = _mm(h.astype(jnp.bfloat16), w2_ref[...]) + b2_ref[...]
    y = _layernorm(x + ff, g_ref[...], b_ref[...])
    if final_ln:
        y = _layernorm(y, gf_ref[...], bf_ref[...])
    o_ref[...] = y


# ----------------------------------------------------------------------------
# Pallas wrappers
# ----------------------------------------------------------------------------

def embed_with_pos(x2d, w, bias_plus_pe):
    M, K = x2d.shape
    E = w.shape[1]
    tm = _row_tile(M)
    return pl.pallas_call(
        _embed_pos_kernel,
        out_shape=jax.ShapeDtypeStruct((M, E), jnp.float32),
        grid=(pl.cdiv(M, tm),),
        in_specs=[
            pl.BlockSpec((tm, K), lambda i: (i, 0)),
            pl.BlockSpec((K, E), lambda i: (0, 0)),
            pl.BlockSpec((1, E), lambda i: (0, 0)),
        ],
        out_specs=pl.BlockSpec((tm, E), lambda i: (i, 0)),
        compiler_params=_mosaic(1),
    )(x2d, w, bias_plus_pe)


def attention_layer(x3, wqkv, bqkv, wo3, bo, g, b, *, B, S, E, H):
    d = E // H
    return pl.pallas_call(
        functools.partial(_attn_layer_kernel, num_heads=H, head_dim=d, embed_dim=E),
        out_shape=jax.ShapeDtypeStruct((B, S, E), jnp.float32),
        grid=(B,),
        in_specs=[
            pl.BlockSpec((None, S, E), lambda i: (i, 0, 0)),       # x (input + residual)
            pl.BlockSpec((E, 3 * E), lambda i: (0, 0)),            # wqkv (bf16)
            pl.BlockSpec((1, 3 * E), lambda i: (0, 0)),            # bqkv
            pl.BlockSpec((H, d, E), lambda i: (0, 0, 0)),          # wo per-head (bf16)
            pl.BlockSpec((1, E), lambda i: (0, 0)),                # bo
            pl.BlockSpec((1, E), lambda i: (0, 0)),                # ln1 gamma
            pl.BlockSpec((1, E), lambda i: (0, 0)),                # ln1 beta
        ],
        out_specs=pl.BlockSpec((None, S, E), lambda i: (i, 0, 0)),
        input_output_aliases={0: 0},
        compiler_params=_mosaic(1),
    )(x3, wqkv, bqkv.reshape(1, 3 * E), wo3,
      bo.reshape(1, E), g.reshape(1, E), b.reshape(1, E))


def ffn_residual_ln(x2d, w1, b1, w2, b2, g, b, final=None):
    M, E = x2d.shape
    F = w1.shape[1]
    tm = _row_tile(M)
    final_ln = final is not None
    in_specs = [
        pl.BlockSpec((tm, E), lambda i: (i, 0)),
        pl.BlockSpec((E, F), lambda i: (0, 0)),
        pl.BlockSpec((1, F), lambda i: (0, 0)),
        pl.BlockSpec((F, E), lambda i: (0, 0)),
        pl.BlockSpec((1, E), lambda i: (0, 0)),
        pl.BlockSpec((1, E), lambda i: (0, 0)),
        pl.BlockSpec((1, E), lambda i: (0, 0)),
    ]
    args = [x2d, w1, b1.reshape(1, F), w2, b2.reshape(1, E),
            g.reshape(1, E), b.reshape(1, E)]
    if final_ln:
        gf, bf = final
        in_specs += [pl.BlockSpec((1, E), lambda i: (0, 0)),
                     pl.BlockSpec((1, E), lambda i: (0, 0))]
        args += [gf.reshape(1, E), bf.reshape(1, E)]
    return pl.pallas_call(
        functools.partial(_ffn_ln_kernel, final_ln=final_ln),
        out_shape=jax.ShapeDtypeStruct((M, E), jnp.float32),
        grid=(pl.cdiv(M, tm),),
        in_specs=in_specs,
        out_specs=pl.BlockSpec((tm, E), lambda i: (i, 0)),
        input_output_aliases={0: 0},
        compiler_params=_mosaic(1),
    )(*args)


# ----------------------------------------------------------------------------
# Parameter construction (deterministic, torch-nn.Linear-style init)
# ----------------------------------------------------------------------------

def _init_linear(key, fan_in, fan_out):
    k1, k2 = jax.random.split(key)
    bound = 1.0 / math.sqrt(fan_in)
    w = jax.random.uniform(k1, (fan_in, fan_out), jnp.float32, -bound, bound)
    b = jax.random.uniform(k2, (fan_out,), jnp.float32, -bound, bound)
    return w, b


def _make_pos_embedding(emb_size, maxlen=201):
    den = jnp.exp(jnp.arange(0, emb_size, 2, dtype=jnp.float32)
                  * (-math.log(10000.0) / emb_size))
    pos = jnp.arange(0, maxlen, dtype=jnp.float32).reshape(maxlen, 1)
    pe = jnp.zeros((maxlen, emb_size), dtype=jnp.float32)
    pe = pe.at[:, 0::2].set(jnp.sin(pos * den))
    pe = pe.at[:, 1::2].set(jnp.cos(pos * den))
    return pe  # (maxlen, emb_size)


def init_params(key, input_dim, embed_dim, num_heads, ff_dim, num_layers):
    head_dim = embed_dim // num_heads
    scale = 1.0 / math.sqrt(head_dim)
    keys = jax.random.split(key, 1 + num_layers)
    emb_w, emb_b = _init_linear(keys[0], input_dim, embed_dim)
    layers = []
    for li in range(num_layers):
        lk = jax.random.split(keys[1 + li], 6)
        wq, bq = _init_linear(lk[0], embed_dim, embed_dim)
        wk, bk = _init_linear(lk[1], embed_dim, embed_dim)
        wv, bv = _init_linear(lk[2], embed_dim, embed_dim)
        wo, bo = _init_linear(lk[3], embed_dim, embed_dim)
        w1, b1 = _init_linear(lk[4], embed_dim, ff_dim)
        w2, b2 = _init_linear(lk[5], ff_dim, embed_dim)
        layers.append(dict(
            # packed QKV projection (bf16); 1/sqrt(head_dim) folded into the Q slice
            wqkv=jnp.concatenate([wq * scale, wk, wv], axis=1).astype(jnp.bfloat16),
            bqkv=jnp.concatenate([bq * scale, bk, bv], axis=0),
            # out projection stored head-major (H, d, E) in bf16
            wo3=wo.reshape(num_heads, head_dim, embed_dim).astype(jnp.bfloat16),
            bo=bo,
            w1=w1.astype(jnp.bfloat16), b1=b1,
            w2=w2.astype(jnp.bfloat16), b2=b2,
            ln1_g=jnp.ones((embed_dim,), jnp.float32),
            ln1_b=jnp.zeros((embed_dim,), jnp.float32),
            ln2_g=jnp.ones((embed_dim,), jnp.float32),
            ln2_b=jnp.zeros((embed_dim,), jnp.float32),
        ))
    return dict(
        emb_w=emb_w.astype(jnp.bfloat16), emb_b=emb_b,
        layers=layers,
        norm_g=jnp.ones((embed_dim,), jnp.float32),
        norm_b=jnp.zeros((embed_dim,), jnp.float32),
        pos_embedding=_make_pos_embedding(embed_dim),
    )


# ----------------------------------------------------------------------------
# Forward pass
# ----------------------------------------------------------------------------

def transformer_encoder_forward(params, traj_o, *, num_heads):
    B, S, input_dim = traj_o.shape
    E = params["emb_w"].shape[1]

    # trajectory embedding + positional encoding (single row at index S, per reference);
    # bias and positional row folded into one (1,E) vector outside the kernel.
    bias_plus_pe = (params["emb_b"] + params["pos_embedding"][S]).reshape(1, E)
    x2d = embed_with_pos(traj_o.reshape(B * S, input_dim), params["emb_w"], bias_plus_pe)
    x3 = x2d.reshape(B, S, E)

    n_layers = len(params["layers"])
    for li, lyr in enumerate(params["layers"]):
        x3 = attention_layer(x3, lyr["wqkv"], lyr["bqkv"], lyr["wo3"], lyr["bo"],
                             lyr["ln1_g"], lyr["ln1_b"], B=B, S=S, E=E, H=num_heads)
        final = (params["norm_g"], params["norm_b"]) if li == n_layers - 1 else None
        x2d = ffn_residual_ln(x3.reshape(B * S, E),
                              lyr["w1"], lyr["b1"], lyr["w2"], lyr["b2"],
                              lyr["ln2_g"], lyr["ln2_b"], final=final)
        x3 = x2d.reshape(B, S, E)
    return x3


# ----------------------------------------------------------------------------
# Main
# ----------------------------------------------------------------------------

if __name__ == "__main__":
    B, S = 2, 8
    input_dim, embed_dim, num_heads, ff_dim, num_layers = 4, 32, 4, 64, 2

    key = jax.random.PRNGKey(0)
    k_param, k_data = jax.random.split(key)

    params = init_params(k_param, input_dim, embed_dim, num_heads, ff_dim, num_layers)
    traj_o = jax.random.normal(k_data, (B, S, input_dim), dtype=jnp.float32)

    fwd = jax.jit(functools.partial(transformer_encoder_forward, num_heads=num_heads))
    out = jax.block_until_ready(fwd(params, traj_o))

    assert out.shape == (B, S, embed_dim)
    assert bool(jnp.all(jnp.isfinite(out)))
    print("KERNEL_OK")
</pallas_src>

<mosaic_0001>
module attributes {stable_mosaic.version = 11 : i64} {
  func.func @_embed_pos_kernel(%arg0: i32, %arg1: memref<16x4xf32, #tpu.memory_space<vmem>>, %arg2: memref<4x32xbf16, #tpu.memory_space<vmem>>, %arg3: memref<1x32xf32, #tpu.memory_space<vmem>>, %arg4: memref<16x32xf32, #tpu.memory_space<vmem>>) attributes {dimension_semantics = [#tpu.dimension_semantics<parallel>], iteration_bounds = array<i64: 1>, scalar_prefetch = 0 : i64, scratch_operands = 0 : i64, tpu.core_type = #tpu.core_type<tc>, window_params = [{transform_indices = @transform_0, window_bounds = array<i64: 16, 4>}, {pipeline_mode = #tpu.pipeline_mode<synchronous>, transform_indices = @transform_1, window_bounds = array<i64: 4, 32>}, {pipeline_mode = #tpu.pipeline_mode<synchronous>, transform_indices = @transform_2, window_bounds = array<i64: 1, 32>}, {transform_indices = @transform_3, window_bounds = array<i64: 16, 32>}]} {
    %c0 = arith.constant 0 : index
    %c0_0 = arith.constant 0 : index
    %0 = vector.load %arg1[%c0, %c0_0] : memref<16x4xf32, #tpu.memory_space<vmem>>, vector<16x4xf32>
    %1 = arith.truncf %0 : vector<16x4xf32> to vector<16x4xbf16>
    %c0_1 = arith.constant 0 : index
    %c0_2 = arith.constant 0 : index
    %2 = vector.load %arg2[%c0_1, %c0_2] : memref<4x32xbf16, #tpu.memory_space<vmem>>, vector<4x32xbf16>
    %cst = arith.constant dense<0.000000e+00> : vector<16x32xf32>
    %3 = tpu.matmul %1, %2, %cst {dimension_numbers = #tpu.dot_dimension_numbers<[1], [0], [0], [1], [0, 0, 1, 1], [], []>} : vector<16x4xbf16>, vector<4x32xbf16>, vector<16x32xf32> -> vector<16x32xf32>
    %c0_3 = arith.constant 0 : index
    %c0_4 = arith.constant 0 : index
    %4 = vector.load %arg3[%c0_3, %c0_4] : memref<1x32xf32, #tpu.memory_space<vmem>>, vector<1x32xf32>
    %5 = vector.broadcast %4 : vector<1x32xf32> to vector<16x32xf32>
    %6 = arith.addf %3, %5 : vector<16x32xf32>
    %c0_5 = arith.constant 0 : index
    %c0_6 = arith.constant 0 : index
    %7 = vector.load %arg4[%c0_5, %c0_6] : memref<16x32xf32, #tpu.memory_space<vmem>>, vector<16x32xf32>
    tpu.vector_store %arg4[%c0_5, %c0_6], %6 {strides = array<i32>} : memref<16x32xf32, #tpu.memory_space<vmem>>, vector<16x32xf32>,
    return
  }
  func.func @transform_0(%arg0: i32) -> (i32, i32) {
    %c0_i32 = arith.constant 0 : i32
    %c0_i32_0 = arith.constant 0 : i32
    return %arg0, %c0_i32 : i32, i32
  }
  func.func @transform_1(%arg0: i32) -> (i32, i32) {
    %c0_i32 = arith.constant 0 : i32
    %c0_i32_0 = arith.constant 0 : i32
    %c0_i32_1 = arith.constant 0 : i32
    return %c0_i32, %c0_i32_0 : i32, i32
  }
  func.func @transform_2(%arg0: i32) -> (i32, i32) {
    %c0_i32 = arith.constant 0 : i32
    %c0_i32_0 = arith.constant 0 : i32
    %c0_i32_1 = arith.constant 0 : i32
    return %c0_i32, %c0_i32_0 : i32, i32
  }
  func.func @transform_3(%arg0: i32) -> (i32, i32) {
    %c0_i32 = arith.constant 0 : i32
    %c0_i32_0 = arith.constant 0 : i32
    return %arg0, %c0_i32 : i32, i32
  }
}

module attributes {stable_mosaic.version = 11 : i64} {
  func.func @_attn_layer_kernel(%arg0: i32, %arg1: memref<1x8x32xf32, #tpu.memory_space<vmem>>, %arg2: memref<32x96xbf16, #tpu.memory_space<vmem>>, %arg3: memref<1x96xf32, #tpu.memory_space<vmem>>, %arg4: memref<4x8x32xbf16, #tpu.memory_space<vmem>>, %arg5: memref<1x32xf32, #tpu.memory_space<vmem>>, %arg6: memref<1x32xf32, #tpu.memory_space<vmem>>, %arg7: memref<1x32xf32, #tpu.memory_space<vmem>>, %arg8: memref<1x8x32xf32, #tpu.memory_space<vmem>>) attributes {dimension_semantics = [#tpu.dimension_semantics<parallel>], iteration_bounds = array<i64: 2>, scalar_prefetch = 0 : i64, scratch_operands = 0 : i64, tpu.core_type = #tpu.core_type<tc>, window_params = [{transform_indices = @transform_0, window_bounds = array<i64: 1, 8, 32>}, {pipeline_mode = #tpu.pipeline_mode<synchronous>, transform_indices = @transform_1, window_bounds = array<i64: 32, 96>}, {pipeline_mode = #tpu.pipeline_mode<synchronous>, transform_indices = @transform_2, window_bounds = array<i64: 1, 96>}, {pipeline_mode = #tpu.pipeline_mode<synchronous>, transform_indices = @transform_3, window_bounds = array<i64: 4, 8, 32>}, {pipeline_mode = #tpu.pipeline_mode<synchronous>, transform_indices = @transform_4, window_bounds = array<i64: 1, 32>}, {pipeline_mode = #tpu.pipeline_mode<synchronous>, transform_indices = @transform_5, window_bounds = array<i64: 1, 32>}, {pipeline_mode = #tpu.pipeline_mode<synchronous>, transform_indices = @transform_6, window_bounds = array<i64: 1, 32>}, {transform_indices = @transform_7, window_bounds = array<i64: 1, 8, 32>}]} {
    %c0 = arith.constant 0 : index
    %c0_0 = arith.constant 0 : index
    %c0_1 = arith.constant 0 : index
    %0 = vector.load %arg1[%c0, %c0_0, %c0_1] : memref<1x8x32xf32, #tpu.memory_space<vmem>>, vector<1x8x32xf32>
    %1 = vector.shape_cast %0 : vector<1x8x32xf32> to vector<8x32xf32>
    %2 = arith.truncf %1 : vector<8x32xf32> to vector<8x32xbf16>
    %c0_2 = arith.constant 0 : index
    %c0_3 = arith.constant 0 : index
    %3 = vector.load %arg2[%c0_2, %c0_3] : memref<32x96xbf16, #tpu.memory_space<vmem>>, vector<32x96xbf16>
    %cst = arith.constant dense<0.000000e+00> : vector<8x96xf32>
    %4 = tpu.matmul %2, %3, %cst {dimension_numbers = #tpu.dot_dimension_numbers<[1], [0], [0], [1], [0, 0, 1, 1], [], []>} : vector<8x32xbf16>, vector<32x96xbf16>, vector<8x96xf32> -> vector<8x96xf32>
    %c0_4 = arith.constant 0 : index
    %c0_5 = arith.constant 0 : index
    %5 = vector.load %arg3[%c0_4, %c0_5] : memref<1x96xf32, #tpu.memory_space<vmem>>, vector<1x96xf32>
    %6 = vector.broadcast %5 : vector<1x96xf32> to vector<8x96xf32>
    %7 = arith.addf %4, %6 : vector<8x96xf32>
    %8 = vector.extract_strided_slice %7 {offsets = [0, 0], sizes = [8, 8], strides = [1, 1]} : vector<8x96xf32> to vector<8x8xf32>
    %9 = arith.truncf %8 : vector<8x8xf32> to vector<8x8xbf16>
    %10 = vector.extract_strided_slice %7 {offsets = [0, 32], sizes = [8, 8], strides = [1, 1]} : vector<8x96xf32> to vector<8x8xf32>
    %11 = arith.truncf %10 : vector<8x8xf32> to vector<8x8xbf16>
    %12 = vector.extract_strided_slice %7 {offsets = [0, 64], sizes = [8, 8], strides = [1, 1]} : vector<8x96xf32> to vector<8x8xf32>
    %13 = arith.truncf %12 : vector<8x8xf32> to vector<8x8xbf16>
    %cst_6 = arith.constant dense<0.000000e+00> : vector<8x8xf32>
    %14 = tpu.matmul %9, %11, %cst_6 {dimension_numbers = #tpu.dot_dimension_numbers<[1], [1], [0], [0], [0, 0, 1, 0], [], []>} : vector<8x8xbf16>, vector<8x8xbf16>, vector<8x8xf32> -> vector<8x8xf32>
    %cst_7 = arith.constant dense<0xFF800000> : vector<8xf32>
    %15 = vector.multi_reduction <maximumf>, %14, %cst_7 [1] : vector<8x8xf32> to vector<8xf32>
    %16 = vector.shape_cast %15 : vector<8xf32> to vector<8x1xf32>
    %17 = vector.broadcast %16 : vector<8x1xf32> to vector<8x8xf32>
    %18 = arith.subf %14, %17 : vector<8x8xf32>
    %19 = math.exp %18 : vector<8x8xf32>
    %cst_8 = arith.constant dense<0.000000e+00> : vector<8xf32>
    %20 = vector.multi_reduction <add>, %19, %cst_8 [1] : vector<8x8xf32> to vector<8xf32>
    %21 = vector.shape_cast %20 : vector<8xf32> to vector<8x1xf32>
    %22 = tpu.reciprocal %21 {approx = true} : vector<8x1xf32> -> vector<8x1xf32>
    %23 = vector.broadcast %22 : vector<8x1xf32> to vector<8x8xf32>
    %24 = arith.mulf %19, %23 : vector<8x8xf32>
    %25 = arith.truncf %24 : vector<8x8xf32> to vector<8x8xbf16>
    %cst_9 = arith.constant dense<0.000000e+00> : vector<8x8xf32>
    %26 = tpu.matmul %25, %13, %cst_9 {dimension_numbers = #tpu.dot_dimension_numbers<[1], [0], [0], [1], [0, 0, 1, 1], [], []>} : vector<8x8xbf16>, vector<8x8xbf16>, vector<8x8xf32> -> vector<8x8xf32>
    %27 = arith.truncf %26 : vector<8x8xf32> to vector<8x8xbf16>
    %c0_10 = arith.constant 0 : index
    %c0_11 = arith.constant 0 : index
    %c0_12 = arith.constant 0 : index
    %28 = vector.load %arg4[%c0_10, %c0_11, %c0_12] : memref<4x8x32xbf16, #tpu.memory_space<vmem>>, vector<1x8x32xbf16>
    %29 = vector.shape_cast %28 : vector<1x8x32xbf16> to vector<8x32xbf16>
    %cst_13 = arith.constant dense<0.000000e+00> : vector<8x32xf32>
    %30 = tpu.matmul %27, %29, %cst_13 {dimension_numbers = #tpu.dot_dimension_numbers<[1], [0], [0], [1], [0, 0, 1, 1], [], []>} : vector<8x8xbf16>, vector<8x32xbf16>, vector<8x32xf32> -> vector<8x32xf32>
    %c0_14 = arith.constant 0 : index
    %c0_15 = arith.constant 0 : index
    %c0_16 = arith.constant 0 : index
    %31 = vector.load %arg8[%c0_14, %c0_15, %c0_16] : memref<1x8x32xf32, #tpu.memory_space<vmem>>, vector<1x8x32xf32>
    %32 = vector.shape_cast %31 : vector<1x8x32xf32> to vector<8x32xf32>
    %33 = vector.shape_cast %30 : vector<8x32xf32> to vector<1x8x32xf32>
    tpu.vector_store %arg8[%c0_14, %c0_15, %c0_16], %33 {strides = array<i32>} : memref<1x8x32xf32, #tpu.memory_space<vmem>>, vector<1x8x32xf32>,
    %34 = vector.extract_strided_slice %7 {offsets = [0, 8], sizes = [8, 8], strides = [1, 1]} : vector<8x96xf32> to vector<8x8xf32>
    %35 = arith.truncf %34 : vector<8x8xf32> to vector<8x8xbf16>
    %36 = vector.extract_strided_slice %7 {offsets = [0, 40], sizes = [8, 8], strides = [1, 1]} : vector<8x96xf32> to vector<8x8xf32>
    %37 = arith.truncf %36 : vector<8x8xf32> to vector<8x8xbf16>
    %38 = vector.extract_strided_slice %7 {offsets = [0, 72], sizes = [8, 8], strides = [1, 1]} : vector<8x96xf32> to vector<8x8xf32>
    %39 = arith.truncf %38 : vector<8x8xf32> to vector<8x8xbf16>
    %cst_17 = arith.constant dense<0.000000e+00> : vector<8x8xf32>
    %40 = tpu.matmul %35, %37, %cst_17 {dimension_numbers = #tpu.dot_dimension_numbers<[1], [1], [0], [0], [0, 0, 1, 0], [], []>} : vector<8x8xbf16>, vector<8x8xbf16>, vector<8x8xf32> -> vector<8x8xf32>
    %cst_18 = arith.constant dense<0xFF800000> : vector<8xf32>
    %41 = vector.multi_reduction <maximumf>, %40, %cst_18 [1] : vector<8x8xf32> to vector<8xf32>
    %42 = vector.shape_cast %41 : vector<8xf32> to vector<8x1xf32>
    %43 = vector.broadcast %42 : vector<8x1xf32> to vector<8x8xf32>
    %44 = arith.subf %40, %43 : vector<8x8xf32>
    %45 = math.exp %44 : vector<8x8xf32>
    %cst_19 = arith.constant dense<0.000000e+00> : vector<8xf32>
    %46 = vector.multi_reduction <add>, %45, %cst_19 [1] : vector<8x8xf32> to vector<8xf32>
    %47 = vector.shape_cast %46 : vector<8xf32> to vector<8x1xf32>
    %48 = tpu.reciprocal %47 {approx = true} : vector<8x1xf32> -> vector<8x1xf32>
    %49 = vector.broadcast %48 : vector<8x1xf32> to vector<8x8xf32>
    %50 = arith.mulf %45, %49 : vector<8x8xf32>
    %51 = arith.truncf %50 : vector<8x8xf32> to vector<8x8xbf16>
    %cst_20 = arith.constant dense<0.000000e+00> : vector<8x8xf32>
    %52 = tpu.matmul %51, %39, %cst_20 {dimension_numbers = #tpu.dot_dimension_numbers<[1], [0], [0], [1], [0, 0, 1, 1], [], []>} : vector<8x8xbf16>, vector<8x8xbf16>, vector<8x8xf32> -> vector<8x8xf32>
    %53 = arith.truncf %52 : vector<8x8xf32> to vector<8x8xbf16>
    %c1 = arith.constant 1 : index
    %c0_21 = arith.constant 0 : index
    %c0_22 = arith.constant 0 : index
    %54 = vector.load %arg4[%c1, %c0_21, %c0_22] : memref<4x8x32xbf16, #tpu.memory_space<vmem>>, vector<1x8x32xbf16>
    %55 = vector.shape_cast %54 : vector<1x8x32xbf16> to vector<8x32xbf16>
    %cst_23 = arith.constant dense<0.000000e+00> : vector<8x32xf32>
    %56 = tpu.matmul %53, %55, %cst_23 {dimension_numbers = #tpu.dot_dimension_numbers<[1], [0], [0], [1], [0, 0, 1, 1], [], []>} : vector<8x8xbf16>, vector<8x32xbf16>, vector<8x32xf32> -> vector<8x32xf32>
    %c0_24 = arith.constant 0 : index
    %c0_25 = arith.constant 0 : index
    %c0_26 = arith.constant 0 : index
    %57 = vector.load %arg8[%c0_24, %c0_25, %c0_26] : memref<1x8x32xf32, #tpu.memory_space<vmem>>, vector<1x8x32xf32>
    %58 = vector.shape_cast %57 : vector<1x8x32xf32> to vector<8x32xf32>
    %59 = arith.addf %58, %56 : vector<8x32xf32>
    %c0_27 = arith.constant 0 : index
    %c0_28 = arith.constant 0 : index
    %c0_29 = arith.constant 0 : index
    %60 = vector.load %arg8[%c0_27, %c0_28, %c0_29] : memref<1x8x32xf32, #tpu.memory_space<vmem>>, vector<1x8x32xf32>
    %61 = vector.shape_cast %60 : vector<1x8x32xf32> to vector<8x32xf32>
    %62 = vector.shape_cast %59 : vector<8x32xf32> to vector<1x8x32xf32>
    tpu.vector_store %arg8[%c0_27, %c0_28, %c0_29], %62 {strides = array<i32>} : memref<1x8x32xf32, #tpu.memory_space<vmem>>, vector<1x8x32xf32>,
    %63 = vector.extract_strided_slice %7 {offsets = [0, 16], sizes = [8, 8], strides = [1, 1]} : vector<8x96xf32> to vector<8x8xf32>
    %64 = arith.truncf %63 : vector<8x8xf32> to vector<8x8xbf16>
    %65 = vector.extract_strided_slice %7 {offsets = [0, 48], sizes = [8, 8], strides = [1, 1]} : vector<8x96xf32> to vector<8x8xf32>
    %66 = arith.truncf %65 : vector<8x8xf32> to vector<8x8xbf16>
    %67 = vector.extract_strided_slice %7 {offsets = [0, 80], sizes = [8, 8], strides = [1, 1]} : vector<8x96xf32> to vector<8x8xf32>
    %68 = arith.truncf %67 : vector<8x8xf32> to vector<8x8xbf16>
    %cst_30 = arith.constant dense<0.000000e+00> : vector<8x8xf32>
    %69 = tpu.matmul %64, %66, %cst_30 {dimension_numbers = #tpu.dot_dimension_numbers<[1], [1], [0], [0], [0, 0, 1, 0], [], []>} : vector<8x8xbf16>, vector<8x8xbf16>, vector<8x8xf32> -> vector<8x8xf32>
    %cst_31 = arith.constant dense<0xFF800000> : vector<8xf32>
    %70 = vector.multi_reduction <maximumf>, %69, %cst_31 [1] : vector<8x8xf32> to vector<8xf32>
    %71 = vector.shape_cast %70 : vector<8xf32> to vector<8x1xf32>
    %72 = vector.broadcast %71 : vector<8x1xf32> to vector<8x8xf32>
    %73 = arith.subf %69, %72 : vector<8x8xf32>
    %74 = math.exp %73 : vector<8x8xf32>
    %cst_32 = arith.constant dense<0.000000e+00> : vector<8xf32>
    %75 = vector.multi_reduction <add>, %74, %cst_32 [1] : vector<8x8xf32> to vector<8xf32>
    %76 = vector.shape_cast %75 : vector<8xf32> to vector<8x1xf32>
    %77 = tpu.reciprocal %76 {approx = true} : vector<8x1xf32> -> vector<8x1xf32>
    %78 = vector.broadcast %77 : vector<8x1xf32> to vector<8x8xf32>
    %79 = arith.mulf %74, %78 : vector<8x8xf32>
    %80 = arith.truncf %79 : vector<8x8xf32> to vector<8x8xbf16>
    %cst_33 = arith.constant dense<0.000000e+00> : vector<8x8xf32>
    %81 = tpu.matmul %80, %68, %cst_33 {dimension_numbers = #tpu.dot_dimension_numbers<[1], [0], [0], [1], [0, 0, 1, 1], [], []>} : vector<8x8xbf16>, vector<8x8xbf16>, vector<8x8xf32> -> vector<8x8xf32>
    %82 = arith.truncf %81 : vector<8x8xf32> to vector<8x8xbf16>
    %c2 = arith.constant 2 : index
    %c0_34 = arith.constant 0 : index
    %c0_35 = arith.constant 0 : index
    %83 = vector.load %arg4[%c2, %c0_34, %c0_35] : memref<4x8x32xbf16, #tpu.memory_space<vmem>>, vector<1x8x32xbf16>
    %84 = vector.shape_cast %83 : vector<1x8x32xbf16> to vector<8x32xbf16>
    %cst_36 = arith.constant dense<0.000000e+00> : vector<8x32xf32>
    %85 = tpu.matmul %82, %84, %cst_36 {dimension_numbers = #tpu.dot_dimension_numbers<[1], [0], [0], [1], [0, 0, 1, 1], [], []>} : vector<8x8xbf16>, vector<8x32xbf16>, vector<8x32xf32> -> vector<8x32xf32>
    %c0_37 = arith.constant 0 : index
    %c0_38 = arith.constant 0 : index
    %c0_39 = arith.constant 0 : index
    %86 = vector.load %arg8[%c0_37, %c0_38, %c0_39] : memref<1x8x32xf32, #tpu.memory_space<vmem>>, vector<1x8x32xf32>
    %87 = vector.shape_cast %86 : vector<1x8x32xf32> to vector<8x32xf32>
    %88 = arith.addf %87, %85 : vector<8x32xf32>
    %c0_40 = arith.constant 0 : index
    %c0_41 = arith.constant 0 : index
    %c0_42 = arith.constant 0 : index
    %89 = vector.load %arg8[%c0_40, %c0_41, %c0_42] : memref<1x8x32xf32, #tpu.memory_space<vmem>>, vector<1x8x32xf32>
    %90 = vector.shape_cast %89 : vector<1x8x32xf32> to vector<8x32xf32>
    %91 = vector.shape_cast %88 : vector<8x32xf32> to vector<1x8x32xf32>
    tpu.vector_store %arg8[%c0_40, %c0_41, %c0_42], %91 {strides = array<i32>} : memref<1x8x32xf32, #tpu.memory_space<vmem>>, vector<1x8x32xf32>,
    %92 = vector.extract_strided_slice %7 {offsets = [0, 24], sizes = [8, 8], strides = [1, 1]} : vector<8x96xf32> to vector<8x8xf32>
    %93 = arith.truncf %92 : vector<8x8xf32> to vector<8x8xbf16>
    %94 = vector.extract_strided_slice %7 {offsets = [0, 56], sizes = [8, 8], strides = [1, 1]} : vector<8x96xf32> to vector<8x8xf32>
    %95 = arith.truncf %94 : vector<8x8xf32> to vector<8x8xbf16>
    %96 = vector.extract_strided_slice %7 {offsets = [0, 88], sizes = [8, 8], strides = [1, 1]} : vector<8x96xf32> to vector<8x8xf32>
    %97 = arith.truncf %96 : vector<8x8xf32> to vector<8x8xbf16>
    %cst_43 = arith.constant dense<0.000000e+00> : vector<8x8xf32>
    %98 = tpu.matmul %93, %95, %cst_43 {dimension_numbers = #tpu.dot_dimension_numbers<[1], [1], [0], [0], [0, 0, 1, 0], [], []>} : vector<8x8xbf16>, vector<8x8xbf16>, vector<8x8xf32> -> vector<8x8xf32>
    %cst_44 = arith.constant dense<0xFF800000> : vector<8xf32>
    %99 = vector.multi_reduction <maximumf>, %98, %cst_44 [1] : vector<8x8xf32> to vector<8xf32>
    %100 = vector.shape_cast %99 : vector<8xf32> to vector<8x1xf32>
    %101 = vector.broadcast %100 : vector<8x1xf32> to vector<8x8xf32>
    %102 = arith.subf %98, %101 : vector<8x8xf32>
    %103 = math.exp %102 : vector<8x8xf32>
    %cst_45 = arith.constant dense<0.000000e+00> : vector<8xf32>
    %104 = vector.multi_reduction <add>, %103, %cst_45 [1] : vector<8x8xf32> to vector<8xf32>
    %105 = vector.shape_cast %104 : vector<8xf32> to vector<8x1xf32>
    %106 = tpu.reciprocal %105 {approx = true} : vector<8x1xf32> -> vector<8x1xf32>
    %107 = vector.broadcast %106 : vector<8x1xf32> to vector<8x8xf32>
    %108 = arith.mulf %103, %107 : vector<8x8xf32>
    %109 = arith.truncf %108 : vector<8x8xf32> to vector<8x8xbf16>
    %cst_46 = arith.constant dense<0.000000e+00> : vector<8x8xf32>
    %110 = tpu.matmul %109, %97, %cst_46 {dimension_numbers = #tpu.dot_dimension_numbers<[1], [0], [0], [1], [0, 0, 1, 1], [], []>} : vector<8x8xbf16>, vector<8x8xbf16>, vector<8x8xf32> -> vector<8x8xf32>
    %111 = arith.truncf %110 : vector<8x8xf32> to vector<8x8xbf16>
    %c3 = arith.constant 3 : index
    %c0_47 = arith.constant 0 : index
    %c0_48 = arith.constant 0 : index
    %112 = vector.load %arg4[%c3, %c0_47, %c0_48] : memref<4x8x32xbf16, #tpu.memory_space<vmem>>, vector<1x8x32xbf16>
    %113 = vector.shape_cast %112 : vector<1x8x32xbf16> to vector<8x32xbf16>
    %cst_49 = arith.constant dense<0.000000e+00> : vector<8x32xf32>
    %114 = tpu.matmul %111, %113, %cst_49 {dimension_numbers = #tpu.dot_dimension_numbers<[1], [0], [0], [1], [0, 0, 1, 1], [], []>} : vector<8x8xbf16>, vector<8x32xbf16>, vector<8x32xf32> -> vector<8x32xf32>
    %c0_50 = arith.constant 0 : index
    %c0_51 = arith.constant 0 : index
    %c0_52 = arith.constant 0 : index
    %115 = vector.load %arg8[%c0_50, %c0_51, %c0_52] : memref<1x8x32xf32, #tpu.memory_space<vmem>>, vector<1x8x32xf32>
    %116 = vector.shape_cast %115 : vector<1x8x32xf32> to vector<8x32xf32>
    %117 = arith.addf %116, %114 : vector<8x32xf32>
    %c0_53 = arith.constant 0 : index
    %c0_54 = arith.constant 0 : index
    %c0_55 = arith.constant 0 : index
    %118 = vector.load %arg8[%c0_53, %c0_54, %c0_55] : memref<1x8x32xf32, #tpu.memory_space<vmem>>, vector<1x8x32xf32>
    %119 = vector.shape_cast %118 : vector<1x8x32xf32> to vector<8x32xf32>
    %120 = vector.shape_cast %117 : vector<8x32xf32> to vector<1x8x32xf32>
    tpu.vector_store %arg8[%c0_53, %c0_54, %c0_55], %120 {strides = array<i32>} : memref<1x8x32xf32, #tpu.memory_space<vmem>>, vector<1x8x32xf32>,
    %c0_56 = arith.constant 0 : index
    %c0_57 = arith.constant 0 : index
    %c0_58 = arith.constant 0 : index
    %121 = vector.load %arg8[%c0_56, %c0_57, %c0_58] : memref<1x8x32xf32, #tpu.memory_space<vmem>>, vector<1x8x32xf32>
    %122 = vector.shape_cast %121 : vector<1x8x32xf32> to vector<8x32xf32>
    %c0_59 = arith.constant 0 : index
    %c0_60 = arith.constant 0 : index
    %123 = vector.load %arg5[%c0_59, %c0_60] : memref<1x32xf32, #tpu.memory_space<vmem>>, vector<1x32xf32>
    %124 = vector.broadcast %123 : vector<1x32xf32> to vector<8x32xf32>
    %125 = arith.addf %122, %124 : vector<8x32xf32>
    %126 = arith.addf %125, %1 : vector<8x32xf32>
    %c0_61 = arith.constant 0 : index
    %c0_62 = arith.constant 0 : index
    %127 = vector.load %arg6[%c0_61, %c0_62] : memref<1x32xf32, #tpu.memory_space<vmem>>, vector<1x32xf32>
    %c0_63 = arith.constant 0 : index
    %c0_64 = arith.constant 0 : index
    %128 = vector.load %arg7[%c0_63, %c0_64] : memref<1x32xf32, #tpu.memory_space<vmem>>, vector<1x32xf32>
    %cst_65 = arith.constant dense<0.000000e+00> : vector<8xf32>
    %129 = vector.multi_reduction <add>, %126, %cst_65 [1] : vector<8x32xf32> to vector<8xf32>
    %130 = vector.shape_cast %129 : vector<8xf32> to vector<8x1xf32>
    %cst_66 = arith.constant 3.200000e+01 : f32
    %131 = vector.broadcast %cst_66 : f32 to vector<8x1xf32>
    %132 = arith.divf %130, %131 : vector<8x1xf32>
    %133 = vector.broadcast %132 : vector<8x1xf32> to vector<8x32xf32>
    %134 = arith.subf %126, %133 : vector<8x32xf32>
    %135 = arith.mulf %134, %134 : vector<8x32xf32>
    %cst_67 = arith.constant dense<0.000000e+00> : vector<8xf32>
    %136 = vector.multi_reduction <add>, %135, %cst_67 [1] : vector<8x32xf32> to vector<8xf32>
    %137 = vector.shape_cast %136 : vector<8xf32> to vector<8x1xf32>
    %cst_68 = arith.constant 3.200000e+01 : f32
    %138 = vector.broadcast %cst_68 : f32 to vector<8x1xf32>
    %139 = arith.divf %137, %138 : vector<8x1xf32>
    %140 = vector.broadcast %132 : vector<8x1xf32> to vector<8x32xf32>
    %141 = arith.subf %126, %140 : vector<8x32xf32>
    %cst_69 = arith.constant 9.99999974E-6 : f32
    %142 = vector.broadcast %cst_69 : f32 to vector<8x1xf32>
    %143 = arith.addf %139, %142 : vector<8x1xf32>
    %144 = math.rsqrt %143 : vector<8x1xf32>
    %145 = vector.broadcast %144 : vector<8x1xf32> to vector<8x32xf32>
    %146 = arith.mulf %141, %145 : vector<8x32xf32>
    %147 = vector.broadcast %127 : vector<1x32xf32> to vector<8x32xf32>
    %148 = arith.mulf %146, %147 : vector<8x32xf32>
    %149 = vector.broadcast %128 : vector<1x32xf32> to vector<8x32xf32>
    %150 = arith.addf %148, %149 : vector<8x32xf32>
    %c0_70 = arith.constant 0 : index
    %c0_71 = arith.constant 0 : index
    %c0_72 = arith.constant 0 : index
    %151 = vector.load %arg8[%c0_70, %c0_71, %c0_72] : memref<1x8x32xf32, #tpu.memory_space<vmem>>, vector<1x8x32xf32>
    %152 = vector.shape_cast %151 : vector<1x8x32xf32> to vector<8x32xf32>
    %153 = vector.shape_cast %150 : vector<8x32xf32> to vector<1x8x32xf32>
    tpu.vector_store %arg8[%c0_70, %c0_71, %c0_72], %153 {strides = array<i32>} : memref<1x8x32xf32, #tpu.memory_space<vmem>>, vector<1x8x32xf32>,
    return
  }
  func.func @transform_0(%arg0: i32) -> (i32, i32, i32) {
    %c0_i32 = arith.constant 0 : i32
    %c0_i32_0 = arith.constant 0 : i32
    %c0_i32_1 = arith.constant 0 : i32
    return %arg0, %c0_i32, %c0_i32_0 : i32, i32, i32
  }
  func.func @transform_1(%arg0: i32) -> (i32, i32) {
    %c0_i32 = arith.constant 0 : i32
    %c0_i32_0 = arith.constant 0 : i32
    %c0_i32_1 = arith.constant 0 : i32
    return %c0_i32, %c0_i32_0 : i32, i32
  }
  func.func @transform_2(%arg0: i32) -> (i32, i32) {
    %c0_i32 = arith.constant 0 : i32
    %c0_i32_0 = arith.constant 0 : i32
    %c0_i32_1 = arith.constant 0 : i32
    return %c0_i32, %c0_i32_0 : i32, i32
  }
  func.func @transform_3(%arg0: i32) -> (i32, i32, i32) {
    %c0_i32 = arith.constant 0 : i32
    %c0_i32_0 = arith.constant 0 : i32
    %c0_i32_1 = arith.constant 0 : i32
    %c0_i32_2 = arith.constant 0 : i32
    return %c0_i32, %c0_i32_0, %c0_i32_1 : i32, i32, i32
  }
  func.func @transform_4(%arg0: i32) -> (i32, i32) {
    %c0_i32 = arith.constant 0 : i32
    %c0_i32_0 = arith.constant 0 : i32
    %c0_i32_1 = arith.constant 0 : i32
    return %c0_i32, %c0_i32_0 : i32, i32
  }
  func.func @transform_5(%arg0: i32) -> (i32, i32) {
    %c0_i32 = arith.constant 0 : i32
    %c0_i32_0 = arith.constant 0 : i32
    %c0_i32_1 = arith.constant 0 : i32
    return %c0_i32, %c0_i32_0 : i32, i32
  }
  func.func @transform_6(%arg0: i32) -> (i32, i32) {
    %c0_i32 = arith.constant 0 : i32
    %c0_i32_0 = arith.constant 0 : i32
    %c0_i32_1 = arith.constant 0 : i32
    return %c0_i32, %c0_i32_0 : i32, i32
  }
  func.func @transform_7(%arg0: i32) -> (i32, i32, i32) {
    %c0_i32 = arith.constant 0 : i32
    %c0_i32_0 = arith.constant 0 : i32
    %c0_i32_1 = arith.constant 0 : i32
    return %arg0, %c0_i32, %c0_i32_0 : i32, i32, i32
  }
}

module attributes {stable_mosaic.version = 11 : i64} {
  func.func @_ffn_ln_kernel(%arg0: i32, %arg1: memref<16x32xf32, #tpu.memory_space<vmem>>, %arg2: memref<32x64xbf16, #tpu.memory_space<vmem>>, %arg3: memref<1x64xf32, #tpu.memory_space<vmem>>, %arg4: memref<64x32xbf16, #tpu.memory_space<vmem>>, %arg5: memref<1x32xf32, #tpu.memory_space<vmem>>, %arg6: memref<1x32xf32, #tpu.memory_space<vmem>>, %arg7: memref<1x32xf32, #tpu.memory_space<vmem>>, %arg8: memref<1x32xf32, #tpu.memory_space<vmem>>, %arg9: memref<1x32xf32, #tpu.memory_space<vmem>>, %arg10: memref<16x32xf32, #tpu.memory_space<vmem>>) attributes {dimension_semantics = [#tpu.dimension_semantics<parallel>], iteration_bounds = array<i64: 1>, scalar_prefetch = 0 : i64, scratch_operands = 0 : i64, tpu.core_type = #tpu.core_type<tc>, window_params = [{transform_indices = @transform_0, window_bounds = array<i64: 16, 32>}, {pipeline_mode = #tpu.pipeline_mode<synchronous>, transform_indices = @transform_1, window_bounds = array<i64: 32, 64>}, {pipeline_mode = #tpu.pipeline_mode<synchronous>, transform_indices = @transform_2, window_bounds = array<i64: 1, 64>}, {pipeline_mode = #tpu.pipeline_mode<synchronous>, transform_indices = @transform_3, window_bounds = array<i64: 64, 32>}, {pipeline_mode = #tpu.pipeline_mode<synchronous>, transform_indices = @transform_4, window_bounds = array<i64: 1, 32>}, {pipeline_mode = #tpu.pipeline_mode<synchronous>, transform_indices = @transform_5, window_bounds = array<i64: 1, 32>}, {pipeline_mode = #tpu.pipeline_mode<synchronous>, transform_indices = @transform_6, window_bounds = array<i64: 1, 32>}, {pipeline_mode = #tpu.pipeline_mode<synchronous>, transform_indices = @transform_7, window_bounds = array<i64: 1, 32>}, {pipeline_mode = #tpu.pipeline_mode<synchronous>, transform_indices = @transform_8, window_bounds = array<i64: 1, 32>}, {transform_indices = @transform_9, window_bounds = array<i64: 16, 32>}]} {
    %c0 = arith.constant 0 : index
    %c0_0 = arith.constant 0 : index
    %0 = vector.load %arg1[%c0, %c0_0] : memref<16x32xf32, #tpu.memory_space<vmem>>, vector<16x32xf32>
    %1 = arith.truncf %0 : vector<16x32xf32> to vector<16x32xbf16>
    %c0_1 = arith.constant 0 : index
    %c0_2 = arith.constant 0 : index
    %2 = vector.load %arg2[%c0_1, %c0_2] : memref<32x64xbf16, #tpu.memory_space<vmem>>, vector<32x64xbf16>
    %cst = arith.constant dense<0.000000e+00> : vector<16x64xf32>
    %3 = tpu.matmul %1, %2, %cst {dimension_numbers = #tpu.dot_dimension_numbers<[1], [0], [0], [1], [0, 0, 1, 1], [], []>} : vector<16x32xbf16>, vector<32x64xbf16>, vector<16x64xf32> -> vector<16x64xf32>
    %c0_3 = arith.constant 0 : index
    %c0_4 = arith.constant 0 : index
    %4 = vector.load %arg3[%c0_3, %c0_4] : memref<1x64xf32, #tpu.memory_space<vmem>>, vector<1x64xf32>
    %5 = vector.broadcast %4 : vector<1x64xf32> to vector<16x64xf32>
    %6 = arith.addf %3, %5 : vector<16x64xf32>
    %cst_5 = arith.constant 0.000000e+00 : f32
    %7 = vector.broadcast %cst_5 : f32 to vector<16x64xf32>
    %8 = arith.maximumf %6, %7 : vector<16x64xf32>
    %9 = arith.truncf %8 : vector<16x64xf32> to vector<16x64xbf16>
    %c0_6 = arith.constant 0 : index
    %c0_7 = arith.constant 0 : index
    %10 = vector.load %arg4[%c0_6, %c0_7] : memref<64x32xbf16, #tpu.memory_space<vmem>>, vector<64x32xbf16>
    %cst_8 = arith.constant dense<0.000000e+00> : vector<16x32xf32>
    %11 = tpu.matmul %9, %10, %cst_8 {dimension_numbers = #tpu.dot_dimension_numbers<[1], [0], [0], [1], [0, 0, 1, 1], [], []>} : vector<16x64xbf16>, vector<64x32xbf16>, vector<16x32xf32> -> vector<16x32xf32>
    %c0_9 = arith.constant 0 : index
    %c0_10 = arith.constant 0 : index
    %12 = vector.load %arg5[%c0_9, %c0_10] : memref<1x32xf32, #tpu.memory_space<vmem>>, vector<1x32xf32>
    %13 = vector.broadcast %12 : vector<1x32xf32> to vector<16x32xf32>
    %14 = arith.addf %11, %13 : vector<16x32xf32>
    %15 = arith.addf %0, %14 : vector<16x32xf32>
    %c0_11 = arith.constant 0 : index
    %c0_12 = arith.constant 0 : index
    %16 = vector.load %arg6[%c0_11, %c0_12] : memref<1x32xf32, #tpu.memory_space<vmem>>, vector<1x32xf32>
    %c0_13 = arith.constant 0 : index
    %c0_14 = arith.constant 0 : index
    %17 = vector.load %arg7[%c0_13, %c0_14] : memref<1x32xf32, #tpu.memory_space<vmem>>, vector<1x32xf32>
    %cst_15 = arith.constant dense<0.000000e+00> : vector<16xf32>
    %18 = vector.multi_reduction <add>, %15, %cst_15 [1] : vector<16x32xf32> to vector<16xf32>
    %19 = vector.shape_cast %18 : vector<16xf32> to vector<16x1xf32>
    %cst_16 = arith.constant 3.200000e+01 : f32
    %20 = vector.broadcast %cst_16 : f32 to vector<16x1xf32>
    %21 = arith.divf %19, %20 : vector<16x1xf32>
    %22 = vector.broadcast %21 : vector<16x1xf32> to vector<16x32xf32>
    %23 = arith.subf %15, %22 : vector<16x32xf32>
    %24 = arith.mulf %23, %23 : vector<16x32xf32>
    %cst_17 = arith.constant dense<0.000000e+00> : vector<16xf32>
    %25 = vector.multi_reduction <add>, %24, %cst_17 [1] : vector<16x32xf32> to vector<16xf32>
    %26 = vector.shape_cast %25 : vector<16xf32> to vector<16x1xf32>
    %cst_18 = arith.constant 3.200000e+01 : f32
    %27 = vector.broadcast %cst_18 : f32 to vector<16x1xf32>
    %28 = arith.divf %26, %27 : vector<16x1xf32>
    %29 = vector.broadcast %21 : vector<16x1xf32> to vector<16x32xf32>
    %30 = arith.subf %15, %29 : vector<16x32xf32>
    %cst_19 = arith.constant 9.99999974E-6 : f32
    %31 = vector.broadcast %cst_19 : f32 to vector<16x1xf32>
    %32 = arith.addf %28, %31 : vector<16x1xf32>
    %33 = math.rsqrt %32 : vector<16x1xf32>
    %34 = vector.broadcast %33 : vector<16x1xf32> to vector<16x32xf32>
    %35 = arith.mulf %30, %34 : vector<16x32xf32>
    %36 = vector.broadcast %16 : vector<1x32xf32> to vector<16x32xf32>
    %37 = arith.mulf %35, %36 : vector<16x32xf32>
    %38 = vector.broadcast %17 : vector<1x32xf32> to vector<16x32xf32>
    %39 = arith.addf %37, %38 : vector<16x32xf32>
    %c0_20 = arith.constant 0 : index
    %c0_21 = arith.constant 0 : index
    %40 = vector.load %arg8[%c0_20, %c0_21] : memref<1x32xf32, #tpu.memory_space<vmem>>, vector<1x32xf32>
    %c0_22 = arith.constant 0 : index
    %c0_23 = arith.constant 0 : index
    %41 = vector.load %arg9[%c0_22, %c0_23] : memref<1x32xf32, #tpu.memory_space<vmem>>, vector<1x32xf32>
    %cst_24 = arith.constant dense<0.000000e+00> : vector<16xf32>
    %42 = vector.multi_reduction <add>, %39, %cst_24 [1] : vector<16x32xf32> to vector<16xf32>
    %43 = vector.shape_cast %42 : vector<16xf32> to vector<16x1xf32>
    %cst_25 = arith.constant 3.200000e+01 : f32
    %44 = vector.broadcast %cst_25 : f32 to vector<16x1xf32>
    %45 = arith.divf %43, %44 : vector<16x1xf32>
    %46 = vector.broadcast %45 : vector<16x1xf32> to vector<16x32xf32>
    %47 = arith.subf %39, %46 : vector<16x32xf32>
    %48 = arith.mulf %47, %47 : vector<16x32xf32>
    %cst_26 = arith.constant dense<0.000000e+00> : vector<16xf32>
    %49 = vector.multi_reduction <add>, %48, %cst_26 [1] : vector<16x32xf32> to vector<16xf32>
    %50 = vector.shape_cast %49 : vector<16xf32> to vector<16x1xf32>
    %cst_27 = arith.constant 3.200000e+01 : f32
    %51 = vector.broadcast %cst_27 : f32 to vector<16x1xf32>
    %52 = arith.divf %50, %51 : vector<16x1xf32>
    %53 = vector.broadcast %45 : vector<16x1xf32> to vector<16x32xf32>
    %54 = arith.subf %39, %53 : vector<16x32xf32>
    %cst_28 = arith.constant 9.99999974E-6 : f32
    %55 = vector.broadcast %cst_28 : f32 to vector<16x1xf32>
    %56 = arith.addf %52, %55 : vector<16x1xf32>
    %57 = math.rsqrt %56 : vector<16x1xf32>
    %58 = vector.broadcast %57 : vector<16x1xf32> to vector<16x32xf32>
    %59 = arith.mulf %54, %58 : vector<16x32xf32>
    %60 = vector.broadcast %40 : vector<1x32xf32> to vector<16x32xf32>
    %61 = arith.mulf %59, %60 : vector<16x32xf32>
    %62 = vector.broadcast %41 : vector<1x32xf32> to vector<16x32xf32>
    %63 = arith.addf %61, %62 : vector<16x32xf32>
    %c0_29 = arith.constant 0 : index
    %c0_30 = arith.constant 0 : index
    %64 = vector.load %arg10[%c0_29, %c0_30] : memref<16x32xf32, #tpu.memory_space<vmem>>, vector<16x32xf32>
    tpu.vector_store %arg10[%c0_29, %c0_30], %63 {strides = array<i32>} : memref<16x32xf32, #tpu.memory_space<vmem>>, vector<16x32xf32>,
    return
  }
  func.func @transform_0(%arg0: i32) -> (i32, i32) {
    %c0_i32 = arith.constant 0 : i32
    %c0_i32_0 = arith.constant 0 : i32
    return %arg0, %c0_i32 : i32, i32
  }
  func.func @transform_1(%arg0: i32) -> (i32, i32) {
    %c0_i32 = arith.constant 0 : i32
    %c0_i32_0 = arith.constant 0 : i32
    %c0_i32_1 = arith.constant 0 : i32
    return %c0_i32, %c0_i32_0 : i32, i32
  }
  func.func @transform_2(%arg0: i32) -> (i32, i32) {
    %c0_i32 = arith.constant 0 : i32
    %c0_i32_0 = arith.constant 0 : i32
    %c0_i32_1 = arith.constant 0 : i32
    return %c0_i32, %c0_i32_0 : i32, i32
  }
  func.func @transform_3(%arg0: i32) -> (i32, i32) {
    %c0_i32 = arith.constant 0 : i32
    %c0_i32_0 = arith.constant 0 : i32
    %c0_i32_1 = arith.constant 0 : i32
    return %c0_i32, %c0_i32_0 : i32, i32
  }
  func.func @transform_4(%arg0: i32) -> (i32, i32) {
    %c0_i32 = arith.constant 0 : i32
    %c0_i32_0 = arith.constant 0 : i32
    %c0_i32_1 = arith.constant 0 : i32
    return %c0_i32, %c0_i32_0 : i32, i32
  }
  func.func @transform_5(%arg0: i32) -> (i32, i32) {
    %c0_i32 = arith.constant 0 : i32
    %c0_i32_0 = arith.constant 0 : i32
    %c0_i32_1 = arith.constant 0 : i32
    return %c0_i32, %c0_i32_0 : i32, i32
  }
  func.func @transform_6(%arg0: i32) -> (i32, i32) {
    %c0_i32 = arith.constant 0 : i32
    %c0_i32_0 = arith.constant 0 : i32
    %c0_i32_1 = arith.constant 0 : i32
    return %c0_i32, %c0_i32_0 : i32, i32
  }
  func.func @transform_7(%arg0: i32) -> (i32, i32) {
    %c0_i32 = arith.constant 0 : i32
    %c0_i32_0 = arith.constant 0 : i32
    %c0_i32_1 = arith.constant 0 : i32
    return %c0_i32, %c0_i32_0 : i32, i32
  }
  func.func @transform_8(%arg0: i32) -> (i32, i32) {
    %c0_i32 = arith.constant 0 : i32
    %c0_i32_0 = arith.constant 0 : i32
    %c0_i32_1 = arith.constant 0 : i32
    return %c0_i32, %c0_i32_0 : i32, i32
  }
  func.func @transform_9(%arg0: i32) -> (i32, i32) {
    %c0_i32 = arith.constant 0 : i32
    %c0_i32_0 = arith.constant 0 : i32
    return %arg0, %c0_i32 : i32, i32
  }
}

module attributes {stable_mosaic.version = 11 : i64} {
  func.func @_ffn_ln_kernel(%arg0: i32, %arg1: memref<16x32xf32, #tpu.memory_space<vmem>>, %arg2: memref<32x64xbf16, #tpu.memory_space<vmem>>, %arg3: memref<1x64xf32, #tpu.memory_space<vmem>>, %arg4: memref<64x32xbf16, #tpu.memory_space<vmem>>, %arg5: memref<1x32xf32, #tpu.memory_space<vmem>>, %arg6: memref<1x32xf32, #tpu.memory_space<vmem>>, %arg7: memref<1x32xf32, #tpu.memory_space<vmem>>, %arg8: memref<16x32xf32, #tpu.memory_space<vmem>>) attributes {dimension_semantics = [#tpu.dimension_semantics<parallel>], iteration_bounds = array<i64: 1>, scalar_prefetch = 0 : i64, scratch_operands = 0 : i64, tpu.core_type = #tpu.core_type<tc>, window_params = [{transform_indices = @transform_0, window_bounds = array<i64: 16, 32>}, {pipeline_mode = #tpu.pipeline_mode<synchronous>, transform_indices = @transform_1, window_bounds = array<i64: 32, 64>}, {pipeline_mode = #tpu.pipeline_mode<synchronous>, transform_indices = @transform_2, window_bounds = array<i64: 1, 64>}, {pipeline_mode = #tpu.pipeline_mode<synchronous>, transform_indices = @transform_3, window_bounds = array<i64: 64, 32>}, {pipeline_mode = #tpu.pipeline_mode<synchronous>, transform_indices = @transform_4, window_bounds = array<i64: 1, 32>}, {pipeline_mode = #tpu.pipeline_mode<synchronous>, transform_indices = @transform_5, window_bounds = array<i64: 1, 32>}, {pipeline_mode = #tpu.pipeline_mode<synchronous>, transform_indices = @transform_6, window_bounds = array<i64: 1, 32>}, {transform_indices = @transform_7, window_bounds = array<i64: 16, 32>}]} {
    %c0 = arith.constant 0 : index
    %c0_0 = arith.constant 0 : index
    %0 = vector.load %arg1[%c0, %c0_0] : memref<16x32xf32, #tpu.memory_space<vmem>>, vector<16x32xf32>
    %1 = arith.truncf %0 : vector<16x32xf32> to vector<16x32xbf16>
    %c0_1 = arith.constant 0 : index
    %c0_2 = arith.constant 0 : index
    %2 = vector.load %arg2[%c0_1, %c0_2] : memref<32x64xbf16, #tpu.memory_space<vmem>>, vector<32x64xbf16>
    %cst = arith.constant dense<0.000000e+00> : vector<16x64xf32>
    %3 = tpu.matmul %1, %2, %cst {dimension_numbers = #tpu.dot_dimension_numbers<[1], [0], [0], [1], [0, 0, 1, 1], [], []>} : vector<16x32xbf16>, vector<32x64xbf16>, vector<16x64xf32> -> vector<16x64xf32>
    %c0_3 = arith.constant 0 : index
    %c0_4 = arith.constant 0 : index
    %4 = vector.load %arg3[%c0_3, %c0_4] : memref<1x64xf32, #tpu.memory_space<vmem>>, vector<1x64xf32>
    %5 = vector.broadcast %4 : vector<1x64xf32> to vector<16x64xf32>
    %6 = arith.addf %3, %5 : vector<16x64xf32>
    %cst_5 = arith.constant 0.000000e+00 : f32
    %7 = vector.broadcast %cst_5 : f32 to vector<16x64xf32>
    %8 = arith.maximumf %6, %7 : vector<16x64xf32>
    %9 = arith.truncf %8 : vector<16x64xf32> to vector<16x64xbf16>
    %c0_6 = arith.constant 0 : index
    %c0_7 = arith.constant 0 : index
    %10 = vector.load %arg4[%c0_6, %c0_7] : memref<64x32xbf16, #tpu.memory_space<vmem>>, vector<64x32xbf16>
    %cst_8 = arith.constant dense<0.000000e+00> : vector<16x32xf32>
    %11 = tpu.matmul %9, %10, %cst_8 {dimension_numbers = #tpu.dot_dimension_numbers<[1], [0], [0], [1], [0, 0, 1, 1], [], []>} : vector<16x64xbf16>, vector<64x32xbf16>, vector<16x32xf32> -> vector<16x32xf32>
    %c0_9 = arith.constant 0 : index
    %c0_10 = arith.constant 0 : index
    %12 = vector.load %arg5[%c0_9, %c0_10] : memref<1x32xf32, #tpu.memory_space<vmem>>, vector<1x32xf32>
    %13 = vector.broadcast %12 : vector<1x32xf32> to vector<16x32xf32>
    %14 = arith.addf %11, %13 : vector<16x32xf32>
    %15 = arith.addf %0, %14 : vector<16x32xf32>
    %c0_11 = arith.constant 0 : index
    %c0_12 = arith.constant 0 : index
    %16 = vector.load %arg6[%c0_11, %c0_12] : memref<1x32xf32, #tpu.memory_space<vmem>>, vector<1x32xf32>
    %c0_13 = arith.constant 0 : index
    %c0_14 = arith.constant 0 : index
    %17 = vector.load %arg7[%c0_13, %c0_14] : memref<1x32xf32, #tpu.memory_space<vmem>>, vector<1x32xf32>
    %cst_15 = arith.constant dense<0.000000e+00> : vector<16xf32>
    %18 = vector.multi_reduction <add>, %15, %cst_15 [1] : vector<16x32xf32> to vector<16xf32>
    %19 = vector.shape_cast %18 : vector<16xf32> to vector<16x1xf32>
    %cst_16 = arith.constant 3.200000e+01 : f32
    %20 = vector.broadcast %cst_16 : f32 to vector<16x1xf32>
    %21 = arith.divf %19, %20 : vector<16x1xf32>
    %22 = vector.broadcast %21 : vector<16x1xf32> to vector<16x32xf32>
    %23 = arith.subf %15, %22 : vector<16x32xf32>
    %24 = arith.mulf %23, %23 : vector<16x32xf32>
    %cst_17 = arith.constant dense<0.000000e+00> : vector<16xf32>
    %25 = vector.multi_reduction <add>, %24, %cst_17 [1] : vector<16x32xf32> to vector<16xf32>
    %26 = vector.shape_cast %25 : vector<16xf32> to vector<16x1xf32>
    %cst_18 = arith.constant 3.200000e+01 : f32
    %27 = vector.broadcast %cst_18 : f32 to vector<16x1xf32>
    %28 = arith.divf %26, %27 : vector<16x1xf32>
    %29 = vector.broadcast %21 : vector<16x1xf32> to vector<16x32xf32>
    %30 = arith.subf %15, %29 : vector<16x32xf32>
    %cst_19 = arith.constant 9.99999974E-6 : f32
    %31 = vector.broadcast %cst_19 : f32 to vector<16x1xf32>
    %32 = arith.addf %28, %31 : vector<16x1xf32>
    %33 = math.rsqrt %32 : vector<16x1xf32>
    %34 = vector.broadcast %33 : vector<16x1xf32> to vector<16x32xf32>
    %35 = arith.mulf %30, %34 : vector<16x32xf32>
    %36 = vector.broadcast %16 : vector<1x32xf32> to vector<16x32xf32>
    %37 = arith.mulf %35, %36 : vector<16x32xf32>
    %38 = vector.broadcast %17 : vector<1x32xf32> to vector<16x32xf32>
    %39 = arith.addf %37, %38 : vector<16x32xf32>
    %c0_20 = arith.constant 0 : index
    %c0_21 = arith.constant 0 : index
    %40 = vector.load %arg8[%c0_20, %c0_21] : memref<16x32xf32, #tpu.memory_space<vmem>>, vector<16x32xf32>
    tpu.vector_store %arg8[%c0_20, %c0_21], %39 {strides = array<i32>} : memref<16x32xf32, #tpu.memory_space<vmem>>, vector<16x32xf32>,
    return
  }
  func.func @transform_0(%arg0: i32) -> (i32, i32) {
    %c0_i32 = arith.constant 0 : i32
    %c0_i32_0 = arith.constant 0 : i32
    return %arg0, %c0_i32 : i32, i32
  }
  func.func @transform_1(%arg0: i32) -> (i32, i32) {
    %c0_i32 = arith.constant 0 : i32
    %c0_i32_0 = arith.constant 0 : i32
    %c0_i32_1 = arith.constant 0 : i32
    return %c0_i32, %c0_i32_0 : i32, i32
  }
  func.func @transform_2(%arg0: i32) -> (i32, i32) {
    %c0_i32 = arith.constant 0 : i32
    %c0_i32_0 = arith.constant 0 : i32
    %c0_i32_1 = arith.constant 0 : i32
    return %c0_i32, %c0_i32_0 : i32, i32
  }
  func.func @transform_3(%arg0: i32) -> (i32, i32) {
    %c0_i32 = arith.constant 0 : i32
    %c0_i32_0 = arith.constant 0 : i32
    %c0_i32_1 = arith.constant 0 : i32
    return %c0_i32, %c0_i32_0 : i32, i32
  }
  func.func @transform_4(%arg0: i32) -> (i32, i32) {
    %c0_i32 = arith.constant 0 : i32
    %c0_i32_0 = arith.constant 0 : i32
    %c0_i32_1 = arith.constant 0 : i32
    return %c0_i32, %c0_i32_0 : i32, i32
  }
  func.func @transform_5(%arg0: i32) -> (i32, i32) {
    %c0_i32 = arith.constant 0 : i32
    %c0_i32_0 = arith.constant 0 : i32
    %c0_i32_1 = arith.constant 0 : i32
    return %c0_i32, %c0_i32_0 : i32, i32
  }
  func.func @transform_6(%arg0: i32) -> (i32, i32) {
    %c0_i32 = arith.constant 0 : i32
    %c0_i32_0 = arith.constant 0 : i32
    %c0_i32_1 = arith.constant 0 : i32
    return %c0_i32, %c0_i32_0 : i32, i32
  }
  func.func @transform_7(%arg0: i32) -> (i32, i32) {
    %c0_i32 = arith.constant 0 : i32
    %c0_i32_0 = arith.constant 0 : i32
    return %arg0, %c0_i32 : i32, i32
  }
}

</mosaic_0001>

<bundles_post_ra>
// kernel: transformer_encoder_forward.5
= control target key start
LH: loop header
LB: loop body
LE: loop exit
PB: predicated region body
PF: predicated region fallthrough
CT: control target
= control target key end

     0   :  { %vm27_vm0 = vcmask 1041408   ;;  %vm23_vm1 = vcmask 31744   ;;  %vm45_vm2 = vcmask 261120   ;;  %s92_s1 = inlined_call_operand.vmem [shape: bf16[4,32], index: 1, kind: input, shape index: {}]   ;;  %s93_s0 = inlined_call_operand.vmem [shape: f32[16,4], index: 0, kind: input, shape index: {}]   ;;  %s94_s2 = inlined_call_operand.vmem [shape: f32[1,32], index: 2, kind: input, shape index: {}]   ;;  %s95_s3 = inlined_call_operand.vmem [shape: f32[16,32], index: 3, kind: output, shape index: {}]  }
   0x1   :  { %v18_v0 = vld [vmem:[%s92_s1] sm:$0x3]  ;;  %v16_v2 = vld [vmem:[%s93_s0 + $0x8] sm:$0xff] }
   0x2   :  { %v15_v1 = vld [vmem:[%s93_s0] sm:$0xff]  ;;  %v29_v3 = vsel %vm27_vm0, %v18_v0, 0 }
   0x3   :  { %v17_v4 = vpack.c.bf16 %v16_v2, %v15_v1  ;;  %38 = vmatpush.bf16.msra.mxu0 %v29_v3  ;;  %v53_v5 = vld [vmem:[%s94_s2] ss:$0 sm:$0xff] }
   0x6   :  { %52 = vmatmul.msk.bf16.vlgmr.msra.gmra.mxu0 %vm23_vm1, %v17_v4 }
  0x83   :  { %v40_v6 = vpop.f32.mrf.mxu0 }
  0x84   :  { %v41_v7 = vadd.f32 %v53_v5, %v40_v6 }
  0x86   :  { %46 = vst.msk [vmem:[%s95_s3] sm:$0xff] %vm45_vm2, %v41_v7 }
  0x8b   :  { %v42_v8 = vpop.f32.mrf.mxu0 }
  0x8c   :  { %v43_v9 = vadd.f32 %v53_v5, %v42_v8 }
  0x8e   :  { %47 = vst.msk [vmem:[%s95_s3 + $0x8] sm:$0xff] %vm45_vm2, %v43_v9 }

// kernel: transformer_encoder_forward.6
= control target key start
LH: loop header
LB: loop body
LE: loop exit
PB: predicated region body
PF: predicated region fallthrough
CT: control target
= control target key end

     0   :  { %s876_s24 = smov 0   ;;  %s1000_s0 = inlined_call_operand.vmem [shape: f32[2,8,32], index: 0, kind: input, shape index: {}, may-alias: {0,7}]   ;;  %s1001_s1 = inlined_call_operand.vmem [shape: bf16[32,96], index: 1, kind: input, shape index: {}]   ;;  %s1002_s2 = inlined_call_operand.vmem [shape: f32[1,96], index: 2, kind: input, shape index: {}]   ;;  %s1003_s3 = inlined_call_operand.vmem [shape: bf16[4,8,32], index: 3, kind: input, shape index: {}]   ;;  %s1004_s4 = inlined_call_operand.vmem [shape: f32[1,32], index: 4, kind: input, shape index: {}]   ;;  %s1005_s5 = inlined_call_operand.vmem [shape: f32[1,32], index: 5, kind: input, shape index: {}]   ;;  %s1006_s6 = inlined_call_operand.vmem [shape: f32[1,32], index: 6, kind: input, shape index: {}]   ;;  %s1007_s7 = inlined_call_operand.vmem [shape: f32[2,8,32], index: 7, kind: output, shape index: {}, may-alias: {0,7}]  }
   0x1 LB: > { %s737_s25 = sadd.s32 4294967295, %s822_s24   ;;  %p741_p0 = scmp.ge.s32.totalorder %s822_s24, 1  ;;  %s822_s24 = sphi %s876_s24, %s17_s24  }
   0x2   : > { %p236_p1 = scmp.lt.s32.totalorder %s822_s24, 3 }
   0x4   : > { %p237_p2 = pnand %p741_p0, %p236_p1 }
   0x5   : > { %p266_p3 = scmp.lt.s32.totalorder (!%p237_p2), %s737_s25, 1  ;;  %s824_s13 = smov (!%p237_p2), 88  }
   0x6   : > { %240 = sbr.rel (%p237_p2) target bundleno = 2162 (0x872), region = 48  ;;  %s825_s14 = smov (!%p237_p2), 96  }
   0x7   : > { %s826_s15 = smov (!%p237_p2), 120   ;;  %s827_s16 = smov (!%p237_p2), 56  }
   0x8   : > { %s828_s17 = smov (!%p237_p2), 112   ;;  %s829_s18 = smov (!%p237_p2), 104  }
   0x9   : > { %s830_s21 = smov (!%p237_p2), 64   ;;  %s831_s22 = smov (!%p237_p2), 80  }
   0xb   : > { %v771_v0 = vld [vmem:[%s1001_s1 + $0x8] sm:$0xff]  ;;  %v770_v1 = vld [vmem:[%s1001_s1] sm:$0xff]  ;;  %s1009_s25 = smov (!%p266_p3, %s737_s25), 1  ;;  %vm297_vm0 = vcmask 261120   ;;  %vm318_vm1 = vcmask 64512   ;;  %vm355_vm2 = vcmask 1043456  }
   0xc   : > { %307 = vmatpush.bf16.msra.mxu0 %v771_v0  ;;  %s742_s30 = sshll.u32 %s1009_s25, 3  ;;  %v792_v4 = vld [vmem:[%s1002_s2] ss:$0 sm:$0xff]  ;;  %s832_s25 = smov 72   ;;  %v758_v48 = vld [vmem:[%s1003_s3 + $0x4] sm:$0xf] }
   0xd   : > { %s269_s10 = scalar_lea.vmem %s1000_s0, %s742_s30  ;;  %v373_v14 = vld [vmem:[%s1003_s3] sm:$0xf]  ;;  %s937_s27 = scalar_lea.vmem %s1007_s7, %s742_s30  ;;  %v457_v49 = vsel %vm355_vm2, %v758_v48, 0 }
   0xe   : > { %v898_v2 = vld [vmem:[%s269_s10] sm:$0xff]  ;;  %v378_v15 = vsel %vm355_vm2, %v373_v14, 0  ;;  %s833_s30 = smov 48   ;;  %s834_s10 = smov 40  }
   0xf   : > { %v276_v3 = vpack.c.bf16 %v898_v2, %v898_v2  ;;  %387 = vmatpush.bf16.msra.mxu3 %v378_v15 }
  0x10   : > { %308 = vmatpush.bf16.msra.mxu0 %v770_v1 }
  0x13   : > { %752 = vmatmul.msk.bf16.vlgmr.msra.gmra.mxu0 %vm297_vm0, %v276_v3 }
  0x14   : > { %466 = vmatpush.bf16.msrb.mxu0 %v457_v49 }
  0x90   : > { %v310_v5 = vpop.f32.mrf.mxu0 }
  0x91   : > { %v311_v6 = vadd.f32 %v792_v4, %v310_v5 }
  0x93   : > { %v906_v7 = vpack.c.bf16 %v311_v6, %v311_v6 }
  0x95   : > { %396 = vrot.lane.b32.xlu2 %v906_v7, %s824_s13  ;;  %316 = vrot.lane.b32.xlu0 %v906_v7, %s825_s14 }
  0x98   : > { %v312_v8 = vpop.f32.mrf.mxu0 }
  0x9d   : > { %394 = vrot.lane.b32.xlu2 %v906_v7, %s826_s15 }
  0xef   : > { %v397_v25 = vpop.permute.xlu2 %396 }
  0xf0   : > { %v402_v29 = vsel %vm318_vm1, %v397_v25, 0 }
  0xf7   : > { %v395_v31 = vpop.permute.xlu2 %394 }
 0x107   : > { %v317_v9 = vpop.permute.xlu0 %316 }
 0x108   : > { %v323_v10 = vsel %vm318_vm1, %v317_v9, 0 }
 0x109   : > { %332 = vmatpush.bf16.xpose.msra.mxu1 %v323_v10 }
 0x110   : > { %753 = vmatmul.msk.bf16.vlgmr.msra.gmra.mxu1 %vm318_vm1, %v906_v7 }
 0x18d   : > { %v334_v11 = vpop.f32.mrf.mxu1 }
 0x18e   : > { %v338_v12 = vsel %vm318_vm1, %v334_v11, -inf }
 0x18f   : > { %339 = vmax.xlane.f32.xlu0 %v338_v12 }
 0x195   : > { %v336_v13 = vpop.f32.mrf.mxu1 }
 0x1a3   : > { %429 = vrot.lane.b32.xlu0 %v906_v7, %s827_s16 }
 0x1ab   : > { %475 = vrot.lane.b32.xlu0 %v906_v7, %s828_s17 }
 0x1b3   : > { %556 = vrot.lane.b32.xlu0 %v906_v7, %s829_s18 }
 0x202   : > { %v340_v16 = vpop.xlane.xlu0 %339 }
 0x203   : > { %v341_v17 = vsub.f32 %v334_v11, %v340_v16 }
 0x205   : > { %v342_v18 = vmul.f32 1.442695, %v341_v17 }
 0x207   : > { %796 = vpow2.f32 %v342_v18 }
 0x20d   : > { %v797_v19 = vpop.eup %796 }
 0x20e   : > { %v344_v20 = vsel %vm318_vm1, %v797_v19, 0.0 }
 0x20f   : > { %345 = vadd.xlane.f32.xlu1 %v344_v20 }
 0x215   : > { %v430_v21 = vpop.permute.xlu0 %429 }
 0x216   : > { %v435_v22 = vsel %vm355_vm2, %v430_v21, 0 }
 0x217   : > { %444 = vmatpush.bf16.msrb.mxu3 %v435_v22 }
 0x21d   : > { %v476_v47 = vpop.permute.xlu0 %475 }
 0x225   : > { %v557_v6 = vpop.permute.xlu0 %556 }
 0x228   : > { %350 = vrot.lane.b32.xlu1 %v906_v7, %s830_s21 }
 0x282   : > { %v346_v23 = vpop.xlane.xlu1 %345 }
 0x283   : > { %798 = vrcp.f32 %v346_v23 }
 0x289   : > { %v799_v24 = vpop.eup %798 }
 0x28a   : > { %v348_v26 = vmul.f32 %v799_v24, %v797_v19  ;;  %v762_v19 = vld [vmem:[%s1003_s3 + $0x8] sm:$0xf] }
 0x28b   : > { %v538_v20 = vsel %vm355_vm2, %v762_v19, 0 }
 0x28c   : > { %v349_v30 = vpack.c.bf16 %v348_v26, %v348_v26 }
 0x29a   : > { %v351_v27 = vpop.permute.xlu1 %350 }
 0x29b   : > { %v357_v28 = vsel %vm355_vm2, %v351_v27, 0 }
 0x29c   : > { %366 = vmatpush.bf16.msra.mxu2 %v357_v28 }
 0x29f   : > { %754 = vmatmul.msk.bf16.vlgmr.msra.gmra.mxu2 %vm318_vm1, %v349_v30 }
 0x2a0   : > { %411 = vmatpush.bf16.xpose.msrb.mxu2 %v402_v29 }
 0x2af   : > { %756 = vmatmul.msk.bf16.vlgmr.msrb.gmra.mxu2 %vm318_vm1, %v395_v31 }
 0x322   : > { %v368_v32 = vpop.f32.mrf.mxu2 }
 0x323   : > { %v372_v33 = vpack.c.bf16 %v368_v32, %v368_v32 }
 0x325   : > { %755 = vmatmul.msk.bf16.vlgmr.msra.gmra.mxu3 %vm318_vm1, %v372_v33 }
 0x326   : > { %547 = vmatpush.bf16.msra.mxu3 %v538_v20 }
 0x32a   : > { %v370_v34 = vpop.f32.mrf.mxu2 }
 0x332   : > { %v413_v35 = vpop.f32.mrf.mxu2 }
 0x333   : > { %v417_v36 = vsel %vm318_vm1, %v413_v35, -inf }
 0x334   : > { %418 = vmax.xlane.f32.xlu2 %v417_v36 }
 0x33a   : > { %v415_v37 = vpop.f32.mrf.mxu2 }
 0x34c   : > { %477 = vrot.lane.b32.xlu2 %v906_v7, %s831_s22 }
 0x3a7   : > { %v419_v38 = vpop.xlane.xlu2 %418 }
 0x3a8   : > { %v420_v39 = vsub.f32 %v413_v35, %v419_v38  ;;  %v389_v40 = vpop.f32.mrf.mxu3 }
 0x3a9   : > { %393 = vst.msk [vmem:[%s937_s27] sm:$0xff] %vm297_vm0, %v389_v40 }
 0x3aa   : > { %v421_v41 = vmul.f32 1.442695, %v420_v39 }
 0x3ac   : > { %800 = vpow2.f32 %v421_v41 }
 0x3af   : > { %v478_v42 = vpop.permute.xlu2 %477 }
 0x3b0   : > { %v391_v43 = vpop.f32.mrf.mxu3  ;;  %v483_v44 = vsel %vm318_vm1, %v478_v42, 0  ;;  %v472_v13 = vld [vmem:[%s937_s27] sm:$0xff] }
 0x3b1   : > { %492 = vmatpush.bf16.xpose.msrb.mxu1 %v483_v44 }
 0x3b2   : > { %v801_v45 = vpop.eup %800 }
 0x3b3   : > { %v423_v46 = vsel %vm318_vm1, %v801_v45, 0.0 }
 0x3b4   : > { %424 = vadd.xlane.f32.xlu1 %v423_v46  ;;  %v793_v46 = vld [vmem:[%s1004_s4] ss:$0 sm:$0xff] }
 0x3b8   : > { %760 = vmatmul.msk.bf16.vlgmr.msrb.gmra.mxu1 %vm318_vm1, %v476_v47 }
 0x3cd   : > { %558 = vrot.lane.b32.xlu1 %v906_v7, %s832_s25 }
 0x427   : > { %v425_v50 = vpop.xlane.xlu1 %424 }
 0x428   : > { %802 = vrcp.f32 %v425_v50 }
 0x42e   : > { %v803_v51 = vpop.eup %802 }
 0x42f   : > { %v427_v52 = vmul.f32 %v803_v51, %v801_v45 }
 0x431   : > { %v428_v53 = vpack.c.bf16 %v427_v52, %v427_v52  ;;  %v835_v52 = vmov 32.0  }
 0x433   : > { %757 = vmatmul.msk.bf16.vlgmr.msrb.gmra.mxu3 %vm318_vm1, %v428_v53 }
 0x435   : > { %v494_v54 = vpop.f32.mrf.mxu1 }
 0x436   : > { %v498_v55 = vsel %vm318_vm1, %v494_v54, -inf }
 0x437   : > { %499 = vmax.xlane.f32.xlu2 %v498_v55 }
 0x43d   : > { %v496_v56 = vpop.f32.mrf.mxu1 }
 0x43f   : > { %v559_v57 = vpop.permute.xlu1 %558 }
 0x440   : > { %v564_v58 = vsel %vm318_vm1, %v559_v57, 0 }
 0x441   : > { %573 = vmatpush.bf16.xpose.msra.mxu0 %v564_v58 }
 0x44f   : > { %510 = vrot.lane.b32.xlu2 %v906_v7, %s833_s30 }
 0x4aa   : > { %v500_v59 = vpop.xlane.xlu2 %499 }
 0x4ab   : > { %v501_v60 = vsub.f32 %v494_v54, %v500_v59 }
 0x4ad   : > { %v502_v61 = vmul.f32 1.442695, %v501_v60 }
 0x4af   : > { %804 = vpow2.f32 %v502_v61 }
 0x4b2   : > { %v511_v62 = vpop.permute.xlu2 %510 }
 0x4b3   : > { %v516_v63 = vsel %vm355_vm2, %v511_v62, 0 }
 0x4b4   : > { %525 = vmatpush.bf16.msra.mxu2 %v516_v63 }
 0x4b5   : > { %v805_v0 = vpop.eup %804 }
 0x4b6   : > { %v446_v1 = vpop.f32.mrf.mxu3  ;;  %v504_v3 = vsel %vm318_vm1, %v805_v0, 0.0 }
 0x4b7   : > { %v450_v4 = vpack.c.bf16 %v446_v1, %v446_v1  ;;  %505 = vadd.xlane.f32.xlu1 %v504_v3 }
 0x4b9   : > { %759 = vmatmul.msk.bf16.vlgmr.msrb.gmra.mxu0 %vm318_vm1, %v450_v4 }
 0x4be   : > { %v448_v5 = vpop.f32.mrf.mxu3 }
 0x4c9   : > { %764 = vmatmul.msk.bf16.vlgmr.msra.gmra.mxu0 %vm318_vm1, %v557_v6 }
 0x52a   : > { %v506_v8 = vpop.xlane.xlu1 %505 }
 0x52b   : > { %806 = vrcp.f32 %v506_v8 }
 0x531   : > { %v807_v9 = vpop.eup %806 }
 0x532   : > { %v508_v10 = vmul.f32 %v807_v9, %v805_v0 }
 0x534   : > { %v509_v11 = vpack.c.bf16 %v508_v10, %v508_v10  ;;  %v794_v10 = vld [vmem:[%s1005_s5] ss:$0 sm:$0xff] }
 0x536   : > { %v468_v12 = vpop.f32.mrf.mxu0  ;;  %761 = vmatmul.msk.bf16.vlgmr.msra.gmra.mxu2 %vm318_vm1, %v509_v11 }
 0x537   : > { %v473_v14 = vadd.f32 %v472_v13, %v468_v12  ;;  %v795_v12 = vld [vmem:[%s1006_s6] ss:$0 sm:$0xff] }
 0x539   : > { %474 = vst.msk [vmem:[%s937_s27] sm:$0xff] %vm297_vm0, %v473_v14 }
 0x53e   : > { %v470_v15 = vpop.f32.mrf.mxu0 }
 0x540   : > { %v553_v30 = vld [vmem:[%s937_s27] sm:$0xff] }
 0x546   : > { %v575_v16 = vpop.f32.mrf.mxu0 }
 0x547   : > { %v579_v17 = vsel %vm318_vm1, %v575_v16, -inf }
 0x548   : > { %580 = vmax.xlane.f32.xlu0 %v579_v17 }
 0x54e   : > { %v577_v18 = vpop.f32.mrf.mxu0 }
 0x5b9   : > { %v527_v21 = vpop.f32.mrf.mxu2 }
 0x5ba   : > { %v531_v22 = vpack.c.bf16 %v527_v21, %v527_v21 }
 0x5bb   : > { %v581_v23 = vpop.xlane.xlu0 %580 }
 0x5bc   : > { %v582_v24 = vsub.f32 %v575_v16, %v581_v23  ;;  %763 = vmatmul.msk.bf16.vlgmr.msra.gmra.mxu3 %vm318_vm1, %v531_v22 }
 0x5be   : > { %v583_v25 = vmul.f32 1.442695, %v582_v24 }
 0x5c0   : > { %808 = vpow2.f32 %v583_v25 }
 0x5c1   : > { %v529_v26 = vpop.f32.mrf.mxu2 }
 0x5c6   : > { %v809_v27 = vpop.eup %808 }
 0x5c7   : > { %v585_v28 = vsel %vm318_vm1, %v809_v27, 0.0 }
 0x5c8   : > { %586 = vadd.xlane.f32.xlu0 %v585_v28 }
 0x5dc   : > { %591 = vrot.lane.b32.xlu0 %v906_v7, %s834_s10  ;;  %v766_v7 = vld [vmem:[%s1003_s3 + $0xc] sm:$0xf] }
 0x5dd   : > { %v619_v39 = vsel %vm355_vm2, %v766_v7, 0 }
 0x5de   : > { %628 = vmatpush.bf16.msrb.mxu2 %v619_v39 }
 0x63b   : > { %v587_v32 = vpop.xlane.xlu0 %586 }
 0x63c   : > { %810 = vrcp.f32 %v587_v32 }
 0x63d   : > { %812 = vrcp.f32 %v835_v52 }
 0x63f   : > { %v549_v29 = vpop.f32.mrf.mxu3 }
 0x640   : > { %v554_v31 = vadd.f32 %v553_v30, %v549_v29 }
 0x642   : > { %555 = vst.msk [vmem:[%s937_s27] sm:$0xff] %vm297_vm0, %v554_v31  ;;  %v811_v34 = vpop.eup %810 }
 0x643   : > { %v589_v35 = vmul.f32 %v811_v34, %v809_v27  ;;  %v813_v53 = vpop.eup %812 }
 0x644   : > { %v650_v54 = vmul.f32 32.0, %v813_v53  ;;  %vm654_vm3 = vweird.f32 %v813_v53 }
 0x645   : > { %v590_v38 = vpack.c.bf16 %v589_v35, %v589_v35 }
 0x646   : > { %v651_v55 = vsub.f32 1.0, %v650_v54 }
 0x647   : > { %v551_v33 = vpop.f32.mrf.mxu3 }
 0x648   : > { %v652_v56 = vmul.f32 %v813_v53, %v651_v55 }
 0x649   : > { %v634_v44 = vld [vmem:[%s937_s27] sm:$0xff] }
 0x64a   : > { %v653_v57 = vadd.f32 %v813_v53, %v652_v56 }
 0x64c   : > { %v655_v58 = vsel %vm654_vm3, %v813_v53, %v653_v57 }
 0x64e   : > { %v592_v36 = vpop.permute.xlu0 %591 }
 0x64f   : > { %v597_v37 = vsel %vm355_vm2, %v592_v36, 0 }
 0x650   : > { %606 = vmatpush.bf16.msra.mxu1 %v597_v37 }
 0x653   : > { %765 = vmatmul.msk.bf16.vlgmr.msra.gmra.mxu1 %vm318_vm1, %v590_v38 }
 0x6d0   : > { %v608_v40 = vpop.f32.mrf.mxu1 }
 0x6d1   : > { %v612_v41 = vpack.c.bf16 %v608_v40, %v608_v40 }
 0x6d3   : > { %767 = vmatmul.msk.bf16.vlgmr.msrb.gmra.mxu2 %vm318_vm1, %v612_v41 }
 0x6d8   : > { %v610_v42 = vpop.f32.mrf.mxu1 }
 0x756   : > { %v630_v43 = vpop.f32.mrf.mxu2 }
 0x757   : > { %v635_v45 = vadd.f32 %v634_v44, %v630_v43 }
 0x759   : > { %636 = vst.msk [vmem:[%s937_s27] sm:$0xff] %vm297_vm0, %v635_v45 }
 0x75e   : > { %v632_v47 = vpop.f32.mrf.mxu2 }
 0x760   : > { %v637_v48 = vld [vmem:[%s937_s27] sm:$0xff] }
 0x761   : > { %v642_v49 = vadd.f32 %v793_v46, %v637_v48 }
 0x763   : > { %v643_v50 = vadd.f32 %v642_v49, %v898_v2 }
 0x765   : > { %v646_v51 = vsel %vm297_vm0, %v643_v50, 0.0 }
 0x766   : > { %647 = vadd.xlane.f32.xlu1 %v646_v51 }
 0x7d9   : > { %v648_v59 = vpop.xlane.xlu1 %647 }
 0x7da   : > { %v656_v60 = vmul.f32 %v655_v58, %v648_v59 }
 0x7dc   : > { %v657_v61 = vsub.f32 %v643_v50, %v656_v60 }
 0x7de   : > { %v658_v62 = vmul.f32 %v657_v61, %v657_v61 }
 0x7e0   : > { %v659_v63 = vsel %vm297_vm0, %v658_v62, 0.0 }
 0x7e1   : > { %660 = vadd.xlane.f32.xlu2 %v659_v63 }
 0x854   : > { %v661_v2 = vpop.xlane.xlu2 %660 }
 0x855   : > { %v662_v0 = vmul.f32 %v661_v2, %v655_v58 }
 0x857   : > { %v663_v1 = vadd.f32 1e-05, %v662_v0 }
 0x859   : > { %814 = vrsqrt.f32 %v663_v1  ;;  %vm670_vm5 = vweird.f32 %v663_v1 }
 0x85f   : > { %v815_v3 = vpop.eup %814 }
 0x860   : > { %v665_v4 = vmul.f32 %v815_v3, %v663_v1  ;;  %vm671_vm4 = vweird.f32 %v815_v3 }
 0x861   : > { %vm672_vm6 = vmor %vm670_vm5, %vm671_vm4 }
 0x862   : > { %v666_v5 = vmul.f32 %v815_v3, %v665_v4 }
 0x864   : > { %v667_v6 = vmul.f32 0.5, %v666_v5 }
 0x866   : > { %v668_v8 = vsub.f32 1.5, %v667_v6 }
 0x868   : > { %v669_v9 = vmul.f32 %v815_v3, %v668_v8 }
 0x86a   : > { %v673_v11 = vsel %vm672_vm6, %v815_v3, %v669_v9 }
 0x86b   : > { %v674_v13 = vmul.f32 %v673_v11, %v657_v61 }
 0x86d   : > { %v678_v14 = vmul.f32 %v794_v10, %v674_v13 }
 0x86f   : > { %v682_v15 = vadd.f32 %v795_v12, %v678_v14 }
 0x871   : > { %683 = vst.msk [vmem:[%s937_s27] sm:$0xff] %vm297_vm0, %v682_v15 }
 0x872 PF: > { %s17_s24 = sadd.s32 1, %s822_s24  }
 0x873   : > { %p14_p4 = scmp.ge.s32.totalorder %s17_s24, 4  }
 0x875   :  { %16 = sbr.rel (!%p14_p4) target bundleno = 1 (0x1), region = 81 }

// kernel: transformer_encoder_forward.9
= control target key start
LH: loop header
LB: loop body
LE: loop exit
PB: predicated region body
PF: predicated region fallthrough
CT: control target
= control target key end

     0   :  { %vm56_vm0 = vcmask 261120   ;;  %vm113_vm1 = vcmask 523264   ;;  %v307_v26 = vmov 32.0   ;;  %s427_s1 = inlined_call_operand.vmem [shape: bf16[32,64], index: 1, kind: input, shape index: {}]   ;;  %s428_s0 = inlined_call_operand.vmem [shape: f32[16,32], index: 0, kind: input, shape index: {}, may-alias: {0,9}]   ;;  %s429_s2 = inlined_call_operand.vmem [shape: f32[1,64], index: 2, kind: input, shape index: {}]   ;;  %s430_s4 = inlined_call_operand.vmem [shape: f32[1,32], index: 4, kind: input, shape index: {}]   ;;  %s431_s3 = inlined_call_operand.vmem [shape: bf16[64,32], index: 3, kind: input, shape index: {}]   ;;  %s432_s5 = inlined_call_operand.vmem [shape: f32[1,32], index: 5, kind: input, shape index: {}]   ;;  %s433_s6 = inlined_call_operand.vmem [shape: f32[1,32], index: 6, kind: input, shape index: {}]   ;;  %s434_s7 = inlined_call_operand.vmem [shape: f32[1,32], index: 7, kind: input, shape index: {}]   ;;  %s435_s8 = inlined_call_operand.vmem [shape: f32[1,32], index: 8, kind: input, shape index: {}]   ;;  %s436_s9 = inlined_call_operand.vmem [shape: f32[16,32], index: 9, kind: output, shape index: {}, may-alias: {0,9}]  }
   0x1   :  { %v285_v0 = vld [vmem:[%s427_s1 + $0x8] sm:$0xff]  ;;  %v284_v1 = vld [vmem:[%s427_s1] sm:$0xff]  ;;  %v289_v5 = vld [vmem:[%s431_s3 + $0x18] sm:$0xff]  ;;  %297 = vrcp.f32 %v307_v26 }
   0x2   :  { %66 = vmatpush.bf16.msra.mxu0 %v285_v0  ;;  %v33_v2 = vld [vmem:[%s428_s0] sm:$0xff]  ;;  %v34_v3 = vld [vmem:[%s428_s0 + $0x8] sm:$0xff]  ;;  %121 = vmatpush.bf16.msra.mxu1 %v289_v5  ;;  %v288_v6 = vld [vmem:[%s431_s3 + $0x10] sm:$0xff] }
   0x3   :  { %v35_v4 = vpack.c.bf16 %v34_v3, %v33_v2  ;;  %v287_v7 = vld [vmem:[%s431_s3 + $0x8] sm:$0xff]  ;;  %v286_v8 = vld [vmem:[%s431_s3] sm:$0xff] }
   0x4   :  { %v291_v10 = vld [vmem:[%s429_s2] ss:$0 sm:$0xff] }
   0x5   :  { %v292_v17 = vld [vmem:[%s430_s4] ss:$0 sm:$0xff] }
   0x6   :  { %67 = vmatpush.bf16.msra.mxu0 %v284_v1  ;;  %122 = vmatpush.bf16.msra.mxu1 %v288_v6  ;;  %v293_v57 = vld [vmem:[%s432_s5] ss:$0 sm:$0xff] }
   0x7   :  { %v298_v27 = vpop.eup %297  ;;  %v294_v61 = vld [vmem:[%s433_s6] ss:$0 sm:$0xff] }
   0x8   :  { %v142_v28 = vmul.f32 32.0, %v298_v27  ;;  %vm146_vm2 = vweird.f32 %v298_v27 }
   0x9   :  { %266 = vmatmul.msk.bf16.vlgmr.msra.gmra.mxu0 %vm56_vm0, %v35_v4 }
   0xa   :  { %123 = vmatpush.bf16.msra.mxu1 %v287_v7  ;;  %v143_v29 = vsub.f32 1.0, %v142_v28 }
   0xc   :  { %v144_v30 = vmul.f32 %v298_v27, %v143_v29 }
   0xe   :  { %124 = vmatpush.bf16.msra.mxu1 %v286_v8  ;;  %v145_v31 = vadd.f32 %v298_v27, %v144_v30 }
  0x10   :  { %v391_v32 = vsel %vm146_vm2, %v298_v27, %v145_v31 }
  0x86   :  { %v69_v9 = vpop.f32.mrf.mxu0 }
  0x87   :  { %v70_v11 = vadd.f32 %v291_v10, %v69_v9 }
  0x89   :  { %v74_v14 = vmax.f32 %v70_v11, 0.0 }
  0x8e   :  { %v71_v12 = vpop.f32.mrf.mxu0 }
  0x8f   :  { %v72_v13 = vadd.f32 %v291_v10, %v71_v12 }
  0x91   :  { %v75_v15 = vmax.f32 %v72_v13, 0.0 }
  0x93   :  { %v76_v16 = vpack.c.bf16 %v75_v15, %v74_v14 }
  0x95   :  { %283 = vmatmul.msk.bf16.vlgmr.msra.gmra.mxu1 %vm113_vm1, %v76_v16 }
 0x112   :  { %v126_v18 = vpop.f32.mrf.mxu1 }
 0x113   :  { %v127_v19 = vadd.f32 %v292_v17, %v126_v18 }
 0x115   :  { %v131_v20 = vadd.f32 %v127_v19, %v33_v2 }
 0x117   :  { %v135_v21 = vsel %vm56_vm0, %v131_v20, 0.0 }
 0x118   :  { %136 = vadd.xlane.f32.xlu0 %v135_v21 }
 0x11a   :  { %v128_v22 = vpop.f32.mrf.mxu1 }
 0x11b   :  { %v129_v23 = vadd.f32 %v292_v17, %v128_v22 }
 0x11d   :  { %v132_v24 = vadd.f32 %v129_v23, %v34_v3 }
 0x11f   :  { %v138_v25 = vsel %vm56_vm0, %v132_v24, 0.0 }
 0x120   :  { %139 = vadd.xlane.f32.xlu0 %v138_v25 }
 0x18b   :  { %v137_v33 = vpop.xlane.xlu0 %136 }
 0x18c   :  { %v148_v34 = vmul.f32 %v391_v32, %v137_v33 }
 0x18e   :  { %v150_v35 = vsub.f32 %v131_v20, %v148_v34  ;;  %v295_v34 = vld [vmem:[%s434_s7] ss:$0 sm:$0xff] }
 0x190   :  { %v152_v36 = vmul.f32 %v150_v35, %v150_v35 }
 0x192   :  { %v154_v37 = vsel %vm56_vm0, %v152_v36, 0.0 }
 0x193   :  { %155 = vadd.xlane.f32.xlu1 %v154_v37  ;;  %v140_v38 = vpop.xlane.xlu0 %139 }
 0x194   :  { %v149_v39 = vmul.f32 %v391_v32, %v140_v38 }
 0x196   :  { %v151_v40 = vsub.f32 %v132_v24, %v149_v39 }
 0x198   :  { %v153_v41 = vmul.f32 %v151_v40, %v151_v40 }
 0x19a   :  { %v157_v42 = vsel %vm56_vm0, %v153_v41, 0.0 }
 0x19b   :  { %158 = vadd.xlane.f32.xlu1 %v157_v42 }
 0x206   :  { %v156_v43 = vpop.xlane.xlu1 %155 }
 0x207   :  { %v160_v44 = vmul.f32 %v156_v43, %v391_v32 }
 0x209   :  { %v162_v45 = vadd.f32 1e-05, %v160_v44 }
 0x20b   :  { %299 = vrsqrt.f32 %v162_v45  ;;  %vm170_vm4 = vweird.f32 %v162_v45 }
 0x20e   :  { %v159_v46 = vpop.xlane.xlu1 %158 }
 0x20f   :  { %v161_v47 = vmul.f32 %v159_v46, %v391_v32 }
 0x211   :  { %v300_v48 = vpop.eup %299  ;;  %v163_v49 = vadd.f32 1e-05, %v161_v47 }
 0x212   :  { %v165_v50 = vmul.f32 %v300_v48, %v162_v45  ;;  %vm171_vm3 = vweird.f32 %v300_v48 }
 0x213   :  { %301 = vrsqrt.f32 %v163_v49  ;;  %vm172_vm5 = vmor %vm170_vm4, %vm171_vm3  ;;  %vm180_vm7 = vweird.f32 %v163_v49 }
 0x214   :  { %v166_v51 = vmul.f32 %v300_v48, %v165_v50 }
 0x216   :  { %v167_v52 = vmul.f32 0.5, %v166_v51 }
 0x218   :  { %v168_v53 = vsub.f32 1.5, %v167_v52 }
 0x219   :  { %v302_v54 = vpop.eup %301 }
 0x21a   :  { %v169_v55 = vmul.f32 %v300_v48, %v168_v53  ;;  %v175_v56 = vmul.f32 %v302_v54, %v163_v49  ;;  %vm181_vm6 = vweird.f32 %v302_v54 }
 0x21b   :  { %vm182_vm8 = vmor %vm180_vm7, %vm181_vm6 }
 0x21c   :  { %v176_v58 = vmul.f32 %v302_v54, %v175_v56  ;;  %v173_v59 = vsel %vm172_vm5, %v300_v48, %v169_v55 }
 0x21d   :  { %v184_v60 = vmul.f32 %v173_v59, %v150_v35 }
 0x21e   :  { %v177_v62 = vmul.f32 0.5, %v176_v58 }
 0x21f   :  { %v189_v63 = vmul.f32 %v293_v57, %v184_v60 }
 0x220   :  { %v178_v0 = vsub.f32 1.5, %v177_v62 }
 0x221   :  { %v194_v1 = vadd.f32 %v294_v61, %v189_v63 }
 0x222   :  { %v179_v2 = vmul.f32 %v302_v54, %v178_v0 }
 0x223   :  { %v198_v3 = vsel %vm56_vm0, %v194_v1, 0.0 }
 0x224   :  { %199 = vadd.xlane.f32.xlu2 %v198_v3  ;;  %v183_v4 = vsel %vm182_vm8, %v302_v54, %v179_v2 }
 0x225   :  { %v185_v5 = vmul.f32 %v183_v4, %v151_v40 }
 0x227   :  { %v190_v6 = vmul.f32 %v293_v57, %v185_v5 }
 0x229   :  { %v195_v7 = vadd.f32 %v294_v61, %v190_v6 }
 0x22b   :  { %v201_v8 = vsel %vm56_vm0, %v195_v7, 0.0 }
 0x22c   :  { %202 = vadd.xlane.f32.xlu2 %v201_v8 }
 0x297   :  { %v200_v9 = vpop.xlane.xlu2 %199 }
 0x298   :  { %v204_v10 = vmul.f32 %v200_v9, %v391_v32 }
 0x29a   :  { %v206_v11 = vsub.f32 %v194_v1, %v204_v10 }
 0x29c   :  { %v208_v12 = vmul.f32 %v206_v11, %v206_v11 }
 0x29e   :  { %v210_v13 = vsel %vm56_vm0, %v208_v12, 0.0 }
 0x29f   :  { %211 = vadd.xlane.f32.xlu0 %v210_v13  ;;  %v203_v14 = vpop.xlane.xlu2 %202 }
 0x2a0   :  { %v205_v15 = vmul.f32 %v203_v14, %v391_v32 }
 0x2a2   :  { %v207_v16 = vsub.f32 %v195_v7, %v205_v15 }
 0x2a4   :  { %v209_v17 = vmul.f32 %v207_v16, %v207_v16 }
 0x2a6   :  { %v213_v18 = vsel %vm56_vm0, %v209_v17, 0.0 }
 0x2a7   :  { %214 = vadd.xlane.f32.xlu1 %v213_v18 }
 0x312   :  { %v212_v19 = vpop.xlane.xlu0 %211 }
 0x313   :  { %v216_v20 = vmul.f32 %v212_v19, %v391_v32 }
 0x315   :  { %v218_v21 = vadd.f32 1e-05, %v216_v20 }
 0x317   :  { %303 = vrsqrt.f32 %v218_v21  ;;  %vm226_vm10 = vweird.f32 %v218_v21 }
 0x31a   :  { %v215_v22 = vpop.xlane.xlu1 %214 }
 0x31b   :  { %v217_v23 = vmul.f32 %v215_v22, %v391_v32  ;;  %v296_v32 = vld [vmem:[%s435_s8] ss:$0 sm:$0xff] }
 0x31d   :  { %v304_v24 = vpop.eup %303  ;;  %v219_v25 = vadd.f32 1e-05, %v217_v23 }
 0x31e   :  { %v221_v26 = vmul.f32 %v304_v24, %v218_v21  ;;  %vm227_vm9 = vweird.f32 %v304_v24 }
 0x31f   :  { %305 = vrsqrt.f32 %v219_v25  ;;  %vm228_vm11 = vmor %vm226_vm10, %vm227_vm9  ;;  %vm236_vm13 = vweird.f32 %v219_v25 }
 0x320   :  { %v222_v27 = vmul.f32 %v304_v24, %v221_v26 }
 0x322   :  { %v223_v28 = vmul.f32 0.5, %v222_v27 }
 0x324   :  { %v224_v29 = vsub.f32 1.5, %v223_v28 }
 0x325   :  { %v306_v30 = vpop.eup %305 }
 0x326   :  { %v225_v31 = vmul.f32 %v304_v24, %v224_v29  ;;  %v231_v33 = vmul.f32 %v306_v30, %v219_v25  ;;  %vm237_vm12 = vweird.f32 %v306_v30 }
 0x327   :  { %vm238_vm14 = vmor %vm236_vm13, %vm237_vm12 }
 0x328   :  { %v229_v35 = vsel %vm228_vm11, %v304_v24, %v225_v31  ;;  %v232_v36 = vmul.f32 %v306_v30, %v231_v33 }
 0x329   :  { %v240_v37 = vmul.f32 %v229_v35, %v206_v11 }
 0x32a   :  { %v233_v38 = vmul.f32 0.5, %v232_v36 }
 0x32b   :  { %v245_v39 = vmul.f32 %v295_v34, %v240_v37 }
 0x32c   :  { %v234_v40 = vsub.f32 1.5, %v233_v38 }
 0x32d   :  { %v250_v41 = vadd.f32 %v296_v32, %v245_v39 }
 0x32e   :  { %v235_v42 = vmul.f32 %v306_v30, %v234_v40 }
 0x32f   :  { %252 = vst.msk [vmem:[%s436_s9] sm:$0xff] %vm56_vm0, %v250_v41 }
 0x330   :  { %v239_v43 = vsel %vm238_vm14, %v306_v30, %v235_v42 }
 0x331   :  { %v241_v44 = vmul.f32 %v239_v43, %v207_v16 }
 0x333   :  { %v246_v45 = vmul.f32 %v295_v34, %v241_v44 }
 0x335   :  { %v251_v46 = vadd.f32 %v296_v32, %v246_v45 }
 0x337   :  { %253 = vst.msk [vmem:[%s436_s9 + $0x8] sm:$0xff] %vm56_vm0, %v251_v46 }

// kernel: transformer_encoder_forward.7
= control target key start
LH: loop header
LB: loop body
LE: loop exit
PB: predicated region body
PF: predicated region fallthrough
CT: control target
= control target key end

     0   :  { %vm50_vm0 = vcmask 261120   ;;  %vm107_vm1 = vcmask 523264   ;;  %v239_v26 = vmov 32.0   ;;  %s329_s1 = inlined_call_operand.vmem [shape: bf16[32,64], index: 1, kind: input, shape index: {}]   ;;  %s330_s0 = inlined_call_operand.vmem [shape: f32[16,32], index: 0, kind: input, shape index: {}, may-alias: {0,7}]   ;;  %s331_s2 = inlined_call_operand.vmem [shape: f32[1,64], index: 2, kind: input, shape index: {}]   ;;  %s332_s4 = inlined_call_operand.vmem [shape: f32[1,32], index: 4, kind: input, shape index: {}]   ;;  %s333_s3 = inlined_call_operand.vmem [shape: bf16[64,32], index: 3, kind: input, shape index: {}]   ;;  %s334_s5 = inlined_call_operand.vmem [shape: f32[1,32], index: 5, kind: input, shape index: {}]   ;;  %s335_s6 = inlined_call_operand.vmem [shape: f32[1,32], index: 6, kind: input, shape index: {}]   ;;  %s336_s7 = inlined_call_operand.vmem [shape: f32[16,32], index: 7, kind: output, shape index: {}, may-alias: {0,7}]  }
   0x1   :  { %v223_v0 = vld [vmem:[%s329_s1 + $0x8] sm:$0xff]  ;;  %v222_v1 = vld [vmem:[%s329_s1] sm:$0xff]  ;;  %v227_v5 = vld [vmem:[%s333_s3 + $0x18] sm:$0xff]  ;;  %233 = vrcp.f32 %v239_v26 }
   0x2   :  { %60 = vmatpush.bf16.msra.mxu0 %v223_v0  ;;  %v27_v2 = vld [vmem:[%s330_s0] sm:$0xff]  ;;  %v28_v3 = vld [vmem:[%s330_s0 + $0x8] sm:$0xff]  ;;  %115 = vmatpush.bf16.msra.mxu1 %v227_v5  ;;  %v226_v6 = vld [vmem:[%s333_s3 + $0x10] sm:$0xff] }
   0x3   :  { %v29_v4 = vpack.c.bf16 %v28_v3, %v27_v2  ;;  %v225_v7 = vld [vmem:[%s333_s3 + $0x8] sm:$0xff]  ;;  %v224_v8 = vld [vmem:[%s333_s3] sm:$0xff] }
   0x4   :  { %v229_v10 = vld [vmem:[%s331_s2] ss:$0 sm:$0xff] }
   0x5   :  { %v230_v17 = vld [vmem:[%s332_s4] ss:$0 sm:$0xff] }
   0x6   :  { %61 = vmatpush.bf16.msra.mxu0 %v222_v1  ;;  %116 = vmatpush.bf16.msra.mxu1 %v226_v6  ;;  %v231_v57 = vld [vmem:[%s334_s5] ss:$0 sm:$0xff] }
   0x7   :  { %v234_v27 = vpop.eup %233  ;;  %v232_v60 = vld [vmem:[%s335_s6] ss:$0 sm:$0xff] }
   0x8   :  { %v136_v28 = vmul.f32 32.0, %v234_v27  ;;  %vm140_vm2 = vweird.f32 %v234_v27 }
   0x9   :  { %204 = vmatmul.msk.bf16.vlgmr.msra.gmra.mxu0 %vm50_vm0, %v29_v4 }
   0xa   :  { %117 = vmatpush.bf16.msra.mxu1 %v225_v7  ;;  %v137_v29 = vsub.f32 1.0, %v136_v28 }
   0xc   :  { %v138_v30 = vmul.f32 %v234_v27, %v137_v29 }
   0xe   :  { %118 = vmatpush.bf16.msra.mxu1 %v224_v8  ;;  %v139_v31 = vadd.f32 %v234_v27, %v138_v30 }
  0x10   :  { %v141_v32 = vsel %vm140_vm2, %v234_v27, %v139_v31 }
  0x86   :  { %v63_v9 = vpop.f32.mrf.mxu0 }
  0x87   :  { %v64_v11 = vadd.f32 %v229_v10, %v63_v9 }
  0x89   :  { %v68_v14 = vmax.f32 %v64_v11, 0.0 }
  0x8e   :  { %v65_v12 = vpop.f32.mrf.mxu0 }
  0x8f   :  { %v66_v13 = vadd.f32 %v229_v10, %v65_v12 }
  0x91   :  { %v69_v15 = vmax.f32 %v66_v13, 0.0 }
  0x93   :  { %v70_v16 = vpack.c.bf16 %v69_v15, %v68_v14 }
  0x95   :  { %221 = vmatmul.msk.bf16.vlgmr.msra.gmra.mxu1 %vm107_vm1, %v70_v16 }
 0x112   :  { %v120_v18 = vpop.f32.mrf.mxu1 }
 0x113   :  { %v121_v19 = vadd.f32 %v230_v17, %v120_v18 }
 0x115   :  { %v125_v20 = vadd.f32 %v121_v19, %v27_v2 }
 0x117   :  { %v129_v21 = vsel %vm50_vm0, %v125_v20, 0.0 }
 0x118   :  { %130 = vadd.xlane.f32.xlu0 %v129_v21 }
 0x11a   :  { %v122_v22 = vpop.f32.mrf.mxu1 }
 0x11b   :  { %v123_v23 = vadd.f32 %v230_v17, %v122_v22 }
 0x11d   :  { %v126_v24 = vadd.f32 %v123_v23, %v28_v3 }
 0x11f   :  { %v132_v25 = vsel %vm50_vm0, %v126_v24, 0.0 }
 0x120   :  { %133 = vadd.xlane.f32.xlu0 %v132_v25 }
 0x18b   :  { %v131_v33 = vpop.xlane.xlu0 %130 }
 0x18c   :  { %v142_v34 = vmul.f32 %v141_v32, %v131_v33 }
 0x18e   :  { %v144_v35 = vsub.f32 %v125_v20, %v142_v34 }
 0x190   :  { %v146_v36 = vmul.f32 %v144_v35, %v144_v35 }
 0x192   :  { %v148_v37 = vsel %vm50_vm0, %v146_v36, 0.0 }
 0x193   :  { %149 = vadd.xlane.f32.xlu1 %v148_v37  ;;  %v134_v38 = vpop.xlane.xlu0 %133 }
 0x194   :  { %v143_v39 = vmul.f32 %v141_v32, %v134_v38 }
 0x196   :  { %v145_v40 = vsub.f32 %v126_v24, %v143_v39 }
 0x198   :  { %v147_v41 = vmul.f32 %v145_v40, %v145_v40 }
 0x19a   :  { %v151_v42 = vsel %vm50_vm0, %v147_v41, 0.0 }
 0x19b   :  { %152 = vadd.xlane.f32.xlu1 %v151_v42 }
 0x206   :  { %v150_v43 = vpop.xlane.xlu1 %149 }
 0x207   :  { %v154_v44 = vmul.f32 %v150_v43, %v141_v32 }
 0x209   :  { %v156_v45 = vadd.f32 1e-05, %v154_v44 }
 0x20b   :  { %235 = vrsqrt.f32 %v156_v45  ;;  %vm164_vm4 = vweird.f32 %v156_v45 }
 0x20e   :  { %v153_v46 = vpop.xlane.xlu1 %152 }
 0x20f   :  { %v155_v47 = vmul.f32 %v153_v46, %v141_v32 }
 0x211   :  { %v236_v48 = vpop.eup %235  ;;  %v157_v49 = vadd.f32 1e-05, %v155_v47 }
 0x212   :  { %v159_v50 = vmul.f32 %v236_v48, %v156_v45  ;;  %vm165_vm3 = vweird.f32 %v236_v48 }
 0x213   :  { %237 = vrsqrt.f32 %v157_v49  ;;  %vm166_vm5 = vmor %vm164_vm4, %vm165_vm3  ;;  %vm174_vm7 = vweird.f32 %v157_v49 }
 0x214   :  { %v160_v51 = vmul.f32 %v236_v48, %v159_v50 }
 0x216   :  { %v161_v52 = vmul.f32 0.5, %v160_v51 }
 0x218   :  { %v162_v53 = vsub.f32 1.5, %v161_v52 }
 0x219   :  { %v238_v54 = vpop.eup %237 }
 0x21a   :  { %v163_v55 = vmul.f32 %v236_v48, %v162_v53  ;;  %v169_v56 = vmul.f32 %v238_v54, %v157_v49  ;;  %vm175_vm6 = vweird.f32 %v238_v54 }
 0x21b   :  { %vm176_vm8 = vmor %vm174_vm7, %vm175_vm6 }
 0x21c   :  { %v167_v58 = vsel %vm166_vm5, %v236_v48, %v163_v55  ;;  %v170_v59 = vmul.f32 %v238_v54, %v169_v56 }
 0x21d   :  { %v178_v61 = vmul.f32 %v167_v58, %v144_v35 }
 0x21e   :  { %v171_v62 = vmul.f32 0.5, %v170_v59 }
 0x21f   :  { %v183_v63 = vmul.f32 %v231_v57, %v178_v61 }
 0x220   :  { %v172_v0 = vsub.f32 1.5, %v171_v62 }
 0x221   :  { %v188_v1 = vadd.f32 %v232_v60, %v183_v63 }
 0x222   :  { %v173_v2 = vmul.f32 %v238_v54, %v172_v0 }
 0x223   :  { %190 = vst.msk [vmem:[%s336_s7] sm:$0xff] %vm50_vm0, %v188_v1 }
 0x224   :  { %v177_v3 = vsel %vm176_vm8, %v238_v54, %v173_v2 }
 0x225   :  { %v179_v4 = vmul.f32 %v177_v3, %v145_v40 }
 0x227   :  { %v184_v5 = vmul.f32 %v231_v57, %v179_v4 }
 0x229   :  { %v189_v6 = vadd.f32 %v232_v60, %v184_v5 }
 0x22b   :  { %191 = vst.msk [vmem:[%s336_s7 + $0x8] sm:$0xff] %vm50_vm0, %v189_v6 }

</bundles_post_ra>
